<compile_context>
chip_gen: v6e
topology: v6e:2x2x1
jax: 0.10.0
libtpu: 0.0.40
codegen_flags: <defaults>
</compile_context>

<pallas_src>
import functools

import jax
import jax.numpy as jnp
from jax import lax
from jax.experimental import pallas as pl
from jax.experimental.pallas import tpu as pltpu


def _lstm_fc_kernel(gx_ref, w_hh_ref, w_fc_ref, b_fc_ref, y_ref, hs_ref, *,
                    seq, batch, hp):
    """Fused LSTM recurrence + (hoisted) Linear head.  Single invocation.

    gx_ref  : (S*B, 4*HP) precomputed x_t @ W_ih^T + (b_ih+b_hh), gate order
              [i, f, o, g], i/f/o pre-scaled by 0.5, lane-padded per gate.
    w_hh_ref: (HP, 4*HP)  recurrent weights, same gate layout/scaling.
    w_fc_ref: (HP, OP)    Linear head weights (rows >= H are zero).
    b_fc_ref: (1, OP)     Linear head bias, lane-padded.
    y_ref   : (S*B, OP)   lane-dense padded output.
    hs_ref  : (S*B, HP)   VMEM scratch holding all h_t for the single head matmul.
    """
    h = jnp.zeros((batch, hp), jnp.float32)
    c = jnp.zeros((batch, hp), jnp.float32)

    # Fully unrolled; every slice below is static and lane-tile aligned.
    for t in range(seq):
        gates = gx_ref[t * batch:(t + 1) * batch, :] + jnp.dot(
            h, w_hh_ref[...], preferred_element_type=jnp.float32)
        # One EUP round-trip for all four gates:
        #   sigmoid(x) = 0.5*tanh(0.5*x) + 0.5, with the 0.5*x folded into the
        #   i/f/o columns of gx and W_hh in the wrapper.
        t_all = jnp.tanh(gates)                       # (B, 4*HP)
        ifo = 0.5 * t_all[:, :3 * hp] + 0.5           # sigmoids of [i | f | o]
        i_g = ifo[:, 0 * hp:1 * hp]
        f_g = ifo[:, 1 * hp:2 * hp]
        o_g = ifo[:, 2 * hp:3 * hp]
        g_g = t_all[:, 3 * hp:]                       # tanh gate
        c = f_g * c + i_g * g_g
        h = o_g * jnp.tanh(c)
        # Off the serial chain: stash h_t for the post-loop head matmul.
        hs_ref[t * batch:(t + 1) * batch, :] = h

    # Single MXU matmul + single lane-dense store for the Linear head.
    y_ref[...] = (jnp.dot(hs_ref[...], w_fc_ref[...],
                          preferred_element_type=jnp.float32)
                  + b_fc_ref[...]).astype(y_ref.dtype)


def lstm_rnn_forward(x, w_ih, w_hh, b_ih, b_hh, w_fc, b_fc):
    """x: (S, B, I).  PyTorch weight shapes: w_ih (4H, I), w_hh (4H, H),
    b_ih/b_hh (4H,), w_fc (O, H), b_fc (O,).  Returns (S, B, O) float32."""
    S, B, I = x.shape
    H = w_hh.shape[1]
    O = w_fc.shape[0]
    HP = ((H + 127) // 128) * 128          # per-gate lane padding (64 -> 128)
    OP = ((O + 127) // 128) * 128          # lane-dense output padding (1 -> 128)

    f32 = jnp.float32
    # PyTorch gate order [i, f, g, o] -> kernel order [i, f, o, g] so the three
    # sigmoid gates are lane-contiguous.
    gate_order = [0, 1, 3, 2]
    # Fold the sigmoid 0.5 pre-scale into i/f/o (g stays unscaled for tanh).
    gate_scale = jnp.array([0.5, 0.5, 0.5, 1.0], f32)

    x_flat = x.reshape(S * B, I).astype(f32)

    # W_ih^T in gate-reordered, pre-scaled, lane-padded layout: (I, 4*HP).
    w_ih_t = w_ih.astype(f32).reshape(4, H, I).transpose(2, 0, 1)   # (I, 4, H)
    w_ih_t = w_ih_t[:, gate_order, :] * gate_scale[None, :, None]
    w_ih_pad = jnp.pad(w_ih_t, ((0, 0), (0, 0), (0, HP - H))).reshape(I, 4 * HP)

    # Combined bias in the same layout: (4*HP,).
    b_g = (b_ih + b_hh).astype(f32).reshape(4, H)
    b_g = b_g[gate_order, :] * gate_scale[:, None]
    b_pad = jnp.pad(b_g, ((0, 0), (0, HP - H))).reshape(4 * HP)

    # Hoisted input projection for all timesteps, directly in padded layout.
    gx_pad = x_flat @ w_ih_pad + b_pad                               # (S*B, 4*HP)

    # W_hh^T in the same gate layout: (HP, 4*HP); zeros outside the real block.
    w_hh_t = w_hh.astype(f32).reshape(4, H, H).transpose(2, 0, 1)    # (H, 4, H)
    w_hh_t = w_hh_t[:, gate_order, :] * gate_scale[None, :, None]
    w_hh_pad = jnp.pad(w_hh_t,
                       ((0, HP - H), (0, 0), (0, HP - H))).reshape(HP, 4 * HP)

    # Padded Linear head (rows beyond H and cols beyond O are zero).
    w_fc_pad = jnp.pad(w_fc.T.astype(f32), ((0, HP - H), (0, OP - O)))  # (HP, OP)
    b_fc_pad = jnp.pad(b_fc.astype(f32), (0, OP - O)).reshape(1, OP)

    kernel = functools.partial(_lstm_fc_kernel, seq=S, batch=B, hp=HP)

    y_pad = pl.pallas_call(
        kernel,
        out_shape=jax.ShapeDtypeStruct((S * B, OP), f32),
        in_specs=[
            pl.BlockSpec(memory_space=pltpu.MemorySpace.VMEM),   # gx (all steps)
            pl.BlockSpec(memory_space=pltpu.MemorySpace.VMEM),   # W_hh^T padded
            pl.BlockSpec(memory_space=pltpu.MemorySpace.VMEM),   # W_fc^T padded
            pl.BlockSpec(memory_space=pltpu.MemorySpace.VMEM),   # b_fc padded
        ],
        out_specs=pl.BlockSpec(memory_space=pltpu.MemorySpace.VMEM),
        scratch_shapes=[pltpu.VMEM((S * B, HP), f32)],           # hs scratch
    )(gx_pad, w_hh_pad, w_fc_pad, b_fc_pad)

    # Drop the lane padding of the output and restore the (S, B, O) view.
    return y_pad[:, :O].reshape(S, B, O)


def lstm_rnn_reference(x, w_ih, w_hh, b_ih, b_hh, w_fc, b_fc):
    """Pure-JAX reference matching PyTorch nn.LSTM + nn.Linear semantics."""
    S, B, I = x.shape
    H = w_hh.shape[1]
    b = b_ih + b_hh

    def step(carry, x_t):
        h, c = carry
        gates = x_t @ w_ih.T + h @ w_hh.T + b
        i_g = jax.nn.sigmoid(gates[:, 0 * H:1 * H])
        f_g = jax.nn.sigmoid(gates[:, 1 * H:2 * H])
        g_g = jnp.tanh(gates[:, 2 * H:3 * H])
        o_g = jax.nn.sigmoid(gates[:, 3 * H:4 * H])
        c_new = f_g * c + i_g * g_g
        h_new = o_g * jnp.tanh(c_new)
        return (h_new, c_new), h_new

    h0 = jnp.zeros((B, H), jnp.float32)
    c0 = jnp.zeros((B, H), jnp.float32)
    _, hs = lax.scan(step, (h0, c0), x)            # (S, B, H)
    y = hs.reshape(S * B, H) @ w_fc.T + b_fc
    return y.reshape(S, B, -1)


if __name__ == "__main__":
    # Module defaults: input_size=1, hidden_layer_size=64, output_size=1.
    SEQ, BATCH, IN, HID, OUT = 8, 2, 1, 64, 1

    key = jax.random.PRNGKey(0)
    keys = jax.random.split(key, 7)
    k = 1.0 / jnp.sqrt(HID)    # PyTorch-style uniform(-1/sqrt(H), 1/sqrt(H)) init

    w_ih = jax.random.uniform(keys[0], (4 * HID, IN), jnp.float32, -k, k)
    w_hh = jax.random.uniform(keys[1], (4 * HID, HID), jnp.float32, -k, k)
    b_ih = jax.random.uniform(keys[2], (4 * HID,), jnp.float32, -k, k)
    b_hh = jax.random.uniform(keys[3], (4 * HID,), jnp.float32, -k, k)
    w_fc = jax.random.uniform(keys[4], (OUT, HID), jnp.float32, -k, k)
    b_fc = jax.random.uniform(keys[5], (OUT,), jnp.float32, -k, k)

    x = jax.random.normal(keys[6], (SEQ, BATCH, IN), jnp.float32)

    y = lstm_rnn_forward(x, w_ih, w_hh, b_ih, b_hh, w_fc, b_fc)
    y = jax.block_until_ready(y)

    y_ref = lstm_rnn_reference(x, w_ih, w_hh, b_ih, b_hh, w_fc, b_fc)

    assert y.shape == (SEQ, BATCH, OUT), y.shape
    assert jnp.allclose(y, y_ref, rtol=1e-5, atol=1e-5), (
        float(jnp.max(jnp.abs(y - y_ref))))

    print("KERNEL_OK")
</pallas_src>

<mosaic_0001>
module attributes {stable_mosaic.version = 11 : i64} {
  func.func @_lstm_fc_kernel(%arg0: memref<16x512xf32, #tpu.memory_space<vmem>>, %arg1: memref<128x512xf32, #tpu.memory_space<vmem>>, %arg2: memref<128x128xf32, #tpu.memory_space<vmem>>, %arg3: memref<1x128xf32, #tpu.memory_space<vmem>>, %arg4: memref<16x128xf32, #tpu.memory_space<vmem>>, %arg5: memref<16x128xf32, #tpu.memory_space<vmem>>) attributes {dimension_semantics = [], scalar_prefetch = 0 : i64, scratch_operands = 1 : i64, tpu.core_type = #tpu.core_type<tc>} {
    %cst = arith.constant 0.000000e+00 : f32
    %0 = vector.broadcast %cst : f32 to vector<2x128xf32>
    %cst_0 = arith.constant 0.000000e+00 : f32
    %1 = vector.broadcast %cst_0 : f32 to vector<2x128xf32>
    %c0 = arith.constant 0 : index
    %c0_1 = arith.constant 0 : index
    %2 = vector.load %arg0[%c0, %c0_1] : memref<16x512xf32, #tpu.memory_space<vmem>>, vector<2x512xf32>
    %c0_2 = arith.constant 0 : index
    %c0_3 = arith.constant 0 : index
    %3 = vector.load %arg1[%c0_2, %c0_3] : memref<128x512xf32, #tpu.memory_space<vmem>>, vector<128x512xf32>
    %cst_4 = arith.constant dense<0.000000e+00> : vector<2x512xf32>
    %4 = tpu.matmul %0, %3, %cst_4 {dimension_numbers = #tpu.dot_dimension_numbers<[1], [0], [0], [1], [0, 0, 1, 1], [], []>} : vector<2x128xf32>, vector<128x512xf32>, vector<2x512xf32> -> vector<2x512xf32>
    %5 = arith.addf %2, %4 : vector<2x512xf32>
    %6 = math.tanh %5 : vector<2x512xf32>
    %7 = vector.extract_strided_slice %6 {offsets = [0, 0], sizes = [2, 384], strides = [1, 1]} : vector<2x512xf32> to vector<2x384xf32>
    %cst_5 = arith.constant 5.000000e-01 : f32
    %8 = vector.broadcast %cst_5 : f32 to vector<2x384xf32>
    %9 = arith.mulf %8, %7 : vector<2x384xf32>
    %cst_6 = arith.constant 5.000000e-01 : f32
    %10 = vector.broadcast %cst_6 : f32 to vector<2x384xf32>
    %11 = arith.addf %9, %10 : vector<2x384xf32>
    %12 = vector.extract_strided_slice %11 {offsets = [0, 0], sizes = [2, 128], strides = [1, 1]} : vector<2x384xf32> to vector<2x128xf32>
    %13 = vector.extract_strided_slice %11 {offsets = [0, 128], sizes = [2, 128], strides = [1, 1]} : vector<2x384xf32> to vector<2x128xf32>
    %14 = vector.extract_strided_slice %11 {offsets = [0, 256], sizes = [2, 128], strides = [1, 1]} : vector<2x384xf32> to vector<2x128xf32>
    %15 = vector.extract_strided_slice %6 {offsets = [0, 384], sizes = [2, 128], strides = [1, 1]} : vector<2x512xf32> to vector<2x128xf32>
    %16 = arith.mulf %13, %1 : vector<2x128xf32>
    %17 = arith.mulf %12, %15 : vector<2x128xf32>
    %18 = arith.addf %16, %17 : vector<2x128xf32>
    %19 = math.tanh %18 : vector<2x128xf32>
    %20 = arith.mulf %14, %19 : vector<2x128xf32>
    %c0_7 = arith.constant 0 : index
    %c0_8 = arith.constant 0 : index
    %21 = vector.load %arg5[%c0_7, %c0_8] : memref<16x128xf32, #tpu.memory_space<vmem>>, vector<2x128xf32>
    tpu.vector_store %arg5[%c0_7, %c0_8], %20 {strides = array<i32>} : memref<16x128xf32, #tpu.memory_space<vmem>>, vector<2x128xf32>,
    %c2 = arith.constant 2 : index
    %c0_9 = arith.constant 0 : index
    %22 = vector.load %arg0[%c2, %c0_9] : memref<16x512xf32, #tpu.memory_space<vmem>>, vector<2x512xf32>
    %c0_10 = arith.constant 0 : index
    %c0_11 = arith.constant 0 : index
    %23 = vector.load %arg1[%c0_10, %c0_11] : memref<128x512xf32, #tpu.memory_space<vmem>>, vector<128x512xf32>
    %cst_12 = arith.constant dense<0.000000e+00> : vector<2x512xf32>
    %24 = tpu.matmul %20, %23, %cst_12 {dimension_numbers = #tpu.dot_dimension_numbers<[1], [0], [0], [1], [0, 0, 1, 1], [], []>} : vector<2x128xf32>, vector<128x512xf32>, vector<2x512xf32> -> vector<2x512xf32>
    %25 = arith.addf %22, %24 : vector<2x512xf32>
    %26 = math.tanh %25 : vector<2x512xf32>
    %27 = vector.extract_strided_slice %26 {offsets = [0, 0], sizes = [2, 384], strides = [1, 1]} : vector<2x512xf32> to vector<2x384xf32>
    %cst_13 = arith.constant 5.000000e-01 : f32
    %28 = vector.broadcast %cst_13 : f32 to vector<2x384xf32>
    %29 = arith.mulf %28, %27 : vector<2x384xf32>
    %cst_14 = arith.constant 5.000000e-01 : f32
    %30 = vector.broadcast %cst_14 : f32 to vector<2x384xf32>
    %31 = arith.addf %29, %30 : vector<2x384xf32>
    %32 = vector.extract_strided_slice %31 {offsets = [0, 0], sizes = [2, 128], strides = [1, 1]} : vector<2x384xf32> to vector<2x128xf32>
    %33 = vector.extract_strided_slice %31 {offsets = [0, 128], sizes = [2, 128], strides = [1, 1]} : vector<2x384xf32> to vector<2x128xf32>
    %34 = vector.extract_strided_slice %31 {offsets = [0, 256], sizes = [2, 128], strides = [1, 1]} : vector<2x384xf32> to vector<2x128xf32>
    %35 = vector.extract_strided_slice %26 {offsets = [0, 384], sizes = [2, 128], strides = [1, 1]} : vector<2x512xf32> to vector<2x128xf32>
    %36 = arith.mulf %33, %18 : vector<2x128xf32>
    %37 = arith.mulf %32, %35 : vector<2x128xf32>
    %38 = arith.addf %36, %37 : vector<2x128xf32>
    %39 = math.tanh %38 : vector<2x128xf32>
    %40 = arith.mulf %34, %39 : vector<2x128xf32>
    %c2_15 = arith.constant 2 : index
    %c0_16 = arith.constant 0 : index
    %41 = vector.load %arg5[%c2_15, %c0_16] : memref<16x128xf32, #tpu.memory_space<vmem>>, vector<2x128xf32>
    tpu.vector_store %arg5[%c2_15, %c0_16], %40 {strides = array<i32>} : memref<16x128xf32, #tpu.memory_space<vmem>>, vector<2x128xf32>,
    %c4 = arith.constant 4 : index
    %c0_17 = arith.constant 0 : index
    %42 = vector.load %arg0[%c4, %c0_17] : memref<16x512xf32, #tpu.memory_space<vmem>>, vector<2x512xf32>
    %c0_18 = arith.constant 0 : index
    %c0_19 = arith.constant 0 : index
    %43 = vector.load %arg1[%c0_18, %c0_19] : memref<128x512xf32, #tpu.memory_space<vmem>>, vector<128x512xf32>
    %cst_20 = arith.constant dense<0.000000e+00> : vector<2x512xf32>
    %44 = tpu.matmul %40, %43, %cst_20 {dimension_numbers = #tpu.dot_dimension_numbers<[1], [0], [0], [1], [0, 0, 1, 1], [], []>} : vector<2x128xf32>, vector<128x512xf32>, vector<2x512xf32> -> vector<2x512xf32>
    %45 = arith.addf %42, %44 : vector<2x512xf32>
    %46 = math.tanh %45 : vector<2x512xf32>
    %47 = vector.extract_strided_slice %46 {offsets = [0, 0], sizes = [2, 384], strides = [1, 1]} : vector<2x512xf32> to vector<2x384xf32>
    %cst_21 = arith.constant 5.000000e-01 : f32
    %48 = vector.broadcast %cst_21 : f32 to vector<2x384xf32>
    %49 = arith.mulf %48, %47 : vector<2x384xf32>
    %cst_22 = arith.constant 5.000000e-01 : f32
    %50 = vector.broadcast %cst_22 : f32 to vector<2x384xf32>
    %51 = arith.addf %49, %50 : vector<2x384xf32>
    %52 = vector.extract_strided_slice %51 {offsets = [0, 0], sizes = [2, 128], strides = [1, 1]} : vector<2x384xf32> to vector<2x128xf32>
    %53 = vector.extract_strided_slice %51 {offsets = [0, 128], sizes = [2, 128], strides = [1, 1]} : vector<2x384xf32> to vector<2x128xf32>
    %54 = vector.extract_strided_slice %51 {offsets = [0, 256], sizes = [2, 128], strides = [1, 1]} : vector<2x384xf32> to vector<2x128xf32>
    %55 = vector.extract_strided_slice %46 {offsets = [0, 384], sizes = [2, 128], strides = [1, 1]} : vector<2x512xf32> to vector<2x128xf32>
    %56 = arith.mulf %53, %38 : vector<2x128xf32>
    %57 = arith.mulf %52, %55 : vector<2x128xf32>
    %58 = arith.addf %56, %57 : vector<2x128xf32>
    %59 = math.tanh %58 : vector<2x128xf32>
    %60 = arith.mulf %54, %59 : vector<2x128xf32>
    %c4_23 = arith.constant 4 : index
    %c0_24 = arith.constant 0 : index
    %61 = vector.load %arg5[%c4_23, %c0_24] : memref<16x128xf32, #tpu.memory_space<vmem>>, vector<2x128xf32>
    tpu.vector_store %arg5[%c4_23, %c0_24], %60 {strides = array<i32>} : memref<16x128xf32, #tpu.memory_space<vmem>>, vector<2x128xf32>,
    %c6 = arith.constant 6 : index
    %c0_25 = arith.constant 0 : index
    %62 = vector.load %arg0[%c6, %c0_25] : memref<16x512xf32, #tpu.memory_space<vmem>>, vector<2x512xf32>
    %c0_26 = arith.constant 0 : index
    %c0_27 = arith.constant 0 : index
    %63 = vector.load %arg1[%c0_26, %c0_27] : memref<128x512xf32, #tpu.memory_space<vmem>>, vector<128x512xf32>
    %cst_28 = arith.constant dense<0.000000e+00> : vector<2x512xf32>
    %64 = tpu.matmul %60, %63, %cst_28 {dimension_numbers = #tpu.dot_dimension_numbers<[1], [0], [0], [1], [0, 0, 1, 1], [], []>} : vector<2x128xf32>, vector<128x512xf32>, vector<2x512xf32> -> vector<2x512xf32>
    %65 = arith.addf %62, %64 : vector<2x512xf32>
    %66 = math.tanh %65 : vector<2x512xf32>
    %67 = vector.extract_strided_slice %66 {offsets = [0, 0], sizes = [2, 384], strides = [1, 1]} : vector<2x512xf32> to vector<2x384xf32>
    %cst_29 = arith.constant 5.000000e-01 : f32
    %68 = vector.broadcast %cst_29 : f32 to vector<2x384xf32>
    %69 = arith.mulf %68, %67 : vector<2x384xf32>
    %cst_30 = arith.constant 5.000000e-01 : f32
    %70 = vector.broadcast %cst_30 : f32 to vector<2x384xf32>
    %71 = arith.addf %69, %70 : vector<2x384xf32>
    %72 = vector.extract_strided_slice %71 {offsets = [0, 0], sizes = [2, 128], strides = [1, 1]} : vector<2x384xf32> to vector<2x128xf32>
    %73 = vector.extract_strided_slice %71 {offsets = [0, 128], sizes = [2, 128], strides = [1, 1]} : vector<2x384xf32> to vector<2x128xf32>
    %74 = vector.extract_strided_slice %71 {offsets = [0, 256], sizes = [2, 128], strides = [1, 1]} : vector<2x384xf32> to vector<2x128xf32>
    %75 = vector.extract_strided_slice %66 {offsets = [0, 384], sizes = [2, 128], strides = [1, 1]} : vector<2x512xf32> to vector<2x128xf32>
    %76 = arith.mulf %73, %58 : vector<2x128xf32>
    %77 = arith.mulf %72, %75 : vector<2x128xf32>
    %78 = arith.addf %76, %77 : vector<2x128xf32>
    %79 = math.tanh %78 : vector<2x128xf32>
    %80 = arith.mulf %74, %79 : vector<2x128xf32>
    %c6_31 = arith.constant 6 : index
    %c0_32 = arith.constant 0 : index
    %81 = vector.load %arg5[%c6_31, %c0_32] : memref<16x128xf32, #tpu.memory_space<vmem>>, vector<2x128xf32>
    tpu.vector_store %arg5[%c6_31, %c0_32], %80 {strides = array<i32>} : memref<16x128xf32, #tpu.memory_space<vmem>>, vector<2x128xf32>,
    %c8 = arith.constant 8 : index
    %c0_33 = arith.constant 0 : index
    %82 = vector.load %arg0[%c8, %c0_33] : memref<16x512xf32, #tpu.memory_space<vmem>>, vector<2x512xf32>
    %c0_34 = arith.constant 0 : index
    %c0_35 = arith.constant 0 : index
    %83 = vector.load %arg1[%c0_34, %c0_35] : memref<128x512xf32, #tpu.memory_space<vmem>>, vector<128x512xf32>
    %cst_36 = arith.constant dense<0.000000e+00> : vector<2x512xf32>
    %84 = tpu.matmul %80, %83, %cst_36 {dimension_numbers = #tpu.dot_dimension_numbers<[1], [0], [0], [1], [0, 0, 1, 1], [], []>} : vector<2x128xf32>, vector<128x512xf32>, vector<2x512xf32> -> vector<2x512xf32>
    %85 = arith.addf %82, %84 : vector<2x512xf32>
    %86 = math.tanh %85 : vector<2x512xf32>
    %87 = vector.extract_strided_slice %86 {offsets = [0, 0], sizes = [2, 384], strides = [1, 1]} : vector<2x512xf32> to vector<2x384xf32>
    %cst_37 = arith.constant 5.000000e-01 : f32
    %88 = vector.broadcast %cst_37 : f32 to vector<2x384xf32>
    %89 = arith.mulf %88, %87 : vector<2x384xf32>
    %cst_38 = arith.constant 5.000000e-01 : f32
    %90 = vector.broadcast %cst_38 : f32 to vector<2x384xf32>
    %91 = arith.addf %89, %90 : vector<2x384xf32>
    %92 = vector.extract_strided_slice %91 {offsets = [0, 0], sizes = [2, 128], strides = [1, 1]} : vector<2x384xf32> to vector<2x128xf32>
    %93 = vector.extract_strided_slice %91 {offsets = [0, 128], sizes = [2, 128], strides = [1, 1]} : vector<2x384xf32> to vector<2x128xf32>
    %94 = vector.extract_strided_slice %91 {offsets = [0, 256], sizes = [2, 128], strides = [1, 1]} : vector<2x384xf32> to vector<2x128xf32>
    %95 = vector.extract_strided_slice %86 {offsets = [0, 384], sizes = [2, 128], strides = [1, 1]} : vector<2x512xf32> to vector<2x128xf32>
    %96 = arith.mulf %93, %78 : vector<2x128xf32>
    %97 = arith.mulf %92, %95 : vector<2x128xf32>
    %98 = arith.addf %96, %97 : vector<2x128xf32>
    %99 = math.tanh %98 : vector<2x128xf32>
    %100 = arith.mulf %94, %99 : vector<2x128xf32>
    %c8_39 = arith.constant 8 : index
    %c0_40 = arith.constant 0 : index
    %101 = vector.load %arg5[%c8_39, %c0_40] : memref<16x128xf32, #tpu.memory_space<vmem>>, vector<2x128xf32>
    tpu.vector_store %arg5[%c8_39, %c0_40], %100 {strides = array<i32>} : memref<16x128xf32, #tpu.memory_space<vmem>>, vector<2x128xf32>,
    %c10 = arith.constant 10 : index
    %c0_41 = arith.constant 0 : index
    %102 = vector.load %arg0[%c10, %c0_41] : memref<16x512xf32, #tpu.memory_space<vmem>>, vector<2x512xf32>
    %c0_42 = arith.constant 0 : index
    %c0_43 = arith.constant 0 : index
    %103 = vector.load %arg1[%c0_42, %c0_43] : memref<128x512xf32, #tpu.memory_space<vmem>>, vector<128x512xf32>
    %cst_44 = arith.constant dense<0.000000e+00> : vector<2x512xf32>
    %104 = tpu.matmul %100, %103, %cst_44 {dimension_numbers = #tpu.dot_dimension_numbers<[1], [0], [0], [1], [0, 0, 1, 1], [], []>} : vector<2x128xf32>, vector<128x512xf32>, vector<2x512xf32> -> vector<2x512xf32>
    %105 = arith.addf %102, %104 : vector<2x512xf32>
    %106 = math.tanh %105 : vector<2x512xf32>
    %107 = vector.extract_strided_slice %106 {offsets = [0, 0], sizes = [2, 384], strides = [1, 1]} : vector<2x512xf32> to vector<2x384xf32>
    %cst_45 = arith.constant 5.000000e-01 : f32
    %108 = vector.broadcast %cst_45 : f32 to vector<2x384xf32>
    %109 = arith.mulf %108, %107 : vector<2x384xf32>
    %cst_46 = arith.constant 5.000000e-01 : f32
    %110 = vector.broadcast %cst_46 : f32 to vector<2x384xf32>
    %111 = arith.addf %109, %110 : vector<2x384xf32>
    %112 = vector.extract_strided_slice %111 {offsets = [0, 0], sizes = [2, 128], strides = [1, 1]} : vector<2x384xf32> to vector<2x128xf32>
    %113 = vector.extract_strided_slice %111 {offsets = [0, 128], sizes = [2, 128], strides = [1, 1]} : vector<2x384xf32> to vector<2x128xf32>
    %114 = vector.extract_strided_slice %111 {offsets = [0, 256], sizes = [2, 128], strides = [1, 1]} : vector<2x384xf32> to vector<2x128xf32>
    %115 = vector.extract_strided_slice %106 {offsets = [0, 384], sizes = [2, 128], strides = [1, 1]} : vector<2x512xf32> to vector<2x128xf32>
    %116 = arith.mulf %113, %98 : vector<2x128xf32>
    %117 = arith.mulf %112, %115 : vector<2x128xf32>
    %118 = arith.addf %116, %117 : vector<2x128xf32>
    %119 = math.tanh %118 : vector<2x128xf32>
    %120 = arith.mulf %114, %119 : vector<2x128xf32>
    %c10_47 = arith.constant 10 : index
    %c0_48 = arith.constant 0 : index
    %121 = vector.load %arg5[%c10_47, %c0_48] : memref<16x128xf32, #tpu.memory_space<vmem>>, vector<2x128xf32>
    tpu.vector_store %arg5[%c10_47, %c0_48], %120 {strides = array<i32>} : memref<16x128xf32, #tpu.memory_space<vmem>>, vector<2x128xf32>,
    %c12 = arith.constant 12 : index
    %c0_49 = arith.constant 0 : index
    %122 = vector.load %arg0[%c12, %c0_49] : memref<16x512xf32, #tpu.memory_space<vmem>>, vector<2x512xf32>
    %c0_50 = arith.constant 0 : index
    %c0_51 = arith.constant 0 : index
    %123 = vector.load %arg1[%c0_50, %c0_51] : memref<128x512xf32, #tpu.memory_space<vmem>>, vector<128x512xf32>
    %cst_52 = arith.constant dense<0.000000e+00> : vector<2x512xf32>
    %124 = tpu.matmul %120, %123, %cst_52 {dimension_numbers = #tpu.dot_dimension_numbers<[1], [0], [0], [1], [0, 0, 1, 1], [], []>} : vector<2x128xf32>, vector<128x512xf32>, vector<2x512xf32> -> vector<2x512xf32>
    %125 = arith.addf %122, %124 : vector<2x512xf32>
    %126 = math.tanh %125 : vector<2x512xf32>
    %127 = vector.extract_strided_slice %126 {offsets = [0, 0], sizes = [2, 384], strides = [1, 1]} : vector<2x512xf32> to vector<2x384xf32>
    %cst_53 = arith.constant 5.000000e-01 : f32
    %128 = vector.broadcast %cst_53 : f32 to vector<2x384xf32>
    %129 = arith.mulf %128, %127 : vector<2x384xf32>
    %cst_54 = arith.constant 5.000000e-01 : f32
    %130 = vector.broadcast %cst_54 : f32 to vector<2x384xf32>
    %131 = arith.addf %129, %130 : vector<2x384xf32>
    %132 = vector.extract_strided_slice %131 {offsets = [0, 0], sizes = [2, 128], strides = [1, 1]} : vector<2x384xf32> to vector<2x128xf32>
    %133 = vector.extract_strided_slice %131 {offsets = [0, 128], sizes = [2, 128], strides = [1, 1]} : vector<2x384xf32> to vector<2x128xf32>
    %134 = vector.extract_strided_slice %131 {offsets = [0, 256], sizes = [2, 128], strides = [1, 1]} : vector<2x384xf32> to vector<2x128xf32>
    %135 = vector.extract_strided_slice %126 {offsets = [0, 384], sizes = [2, 128], strides = [1, 1]} : vector<2x512xf32> to vector<2x128xf32>
    %136 = arith.mulf %133, %118 : vector<2x128xf32>
    %137 = arith.mulf %132, %135 : vector<2x128xf32>
    %138 = arith.addf %136, %137 : vector<2x128xf32>
    %139 = math.tanh %138 : vector<2x128xf32>
    %140 = arith.mulf %134, %139 : vector<2x128xf32>
    %c12_55 = arith.constant 12 : index
    %c0_56 = arith.constant 0 : index
    %141 = vector.load %arg5[%c12_55, %c0_56] : memref<16x128xf32, #tpu.memory_space<vmem>>, vector<2x128xf32>
    tpu.vector_store %arg5[%c12_55, %c0_56], %140 {strides = array<i32>} : memref<16x128xf32, #tpu.memory_space<vmem>>, vector<2x128xf32>,
    %c14 = arith.constant 14 : index
    %c0_57 = arith.constant 0 : index
    %142 = vector.load %arg0[%c14, %c0_57] : memref<16x512xf32, #tpu.memory_space<vmem>>, vector<2x512xf32>
    %c0_58 = arith.constant 0 : index
    %c0_59 = arith.constant 0 : index
    %143 = vector.load %arg1[%c0_58, %c0_59] : memref<128x512xf32, #tpu.memory_space<vmem>>, vector<128x512xf32>
    %cst_60 = arith.constant dense<0.000000e+00> : vector<2x512xf32>
    %144 = tpu.matmul %140, %143, %cst_60 {dimension_numbers = #tpu.dot_dimension_numbers<[1], [0], [0], [1], [0, 0, 1, 1], [], []>} : vector<2x128xf32>, vector<128x512xf32>, vector<2x512xf32> -> vector<2x512xf32>
    %145 = arith.addf %142, %144 : vector<2x512xf32>
    %146 = math.tanh %145 : vector<2x512xf32>
    %147 = vector.extract_strided_slice %146 {offsets = [0, 0], sizes = [2, 384], strides = [1, 1]} : vector<2x512xf32> to vector<2x384xf32>
    %cst_61 = arith.constant 5.000000e-01 : f32
    %148 = vector.broadcast %cst_61 : f32 to vector<2x384xf32>
    %149 = arith.mulf %148, %147 : vector<2x384xf32>
    %cst_62 = arith.constant 5.000000e-01 : f32
    %150 = vector.broadcast %cst_62 : f32 to vector<2x384xf32>
    %151 = arith.addf %149, %150 : vector<2x384xf32>
    %152 = vector.extract_strided_slice %151 {offsets = [0, 0], sizes = [2, 128], strides = [1, 1]} : vector<2x384xf32> to vector<2x128xf32>
    %153 = vector.extract_strided_slice %151 {offsets = [0, 128], sizes = [2, 128], strides = [1, 1]} : vector<2x384xf32> to vector<2x128xf32>
    %154 = vector.extract_strided_slice %151 {offsets = [0, 256], sizes = [2, 128], strides = [1, 1]} : vector<2x384xf32> to vector<2x128xf32>
    %155 = vector.extract_strided_slice %146 {offsets = [0, 384], sizes = [2, 128], strides = [1, 1]} : vector<2x512xf32> to vector<2x128xf32>
    %156 = arith.mulf %153, %138 : vector<2x128xf32>
    %157 = arith.mulf %152, %155 : vector<2x128xf32>
    %158 = arith.addf %156, %157 : vector<2x128xf32>
    %159 = math.tanh %158 : vector<2x128xf32>
    %160 = arith.mulf %154, %159 : vector<2x128xf32>
    %c14_63 = arith.constant 14 : index
    %c0_64 = arith.constant 0 : index
    %161 = vector.load %arg5[%c14_63, %c0_64] : memref<16x128xf32, #tpu.memory_space<vmem>>, vector<2x128xf32>
    tpu.vector_store %arg5[%c14_63, %c0_64], %160 {strides = array<i32>} : memref<16x128xf32, #tpu.memory_space<vmem>>, vector<2x128xf32>,
    %c0_65 = arith.constant 0 : index
    %c0_66 = arith.constant 0 : index
    %162 = vector.load %arg5[%c0_65, %c0_66] : memref<16x128xf32, #tpu.memory_space<vmem>>, vector<16x128xf32>
    %c0_67 = arith.constant 0 : index
    %c0_68 = arith.constant 0 : index
    %163 = vector.load %arg2[%c0_67, %c0_68] : memref<128x128xf32, #tpu.memory_space<vmem>>, vector<128x128xf32>
    %cst_69 = arith.constant dense<0.000000e+00> : vector<16x128xf32>
    %164 = tpu.matmul %162, %163, %cst_69 {dimension_numbers = #tpu.dot_dimension_numbers<[1], [0], [0], [1], [0, 0, 1, 1], [], []>} : vector<16x128xf32>, vector<128x128xf32>, vector<16x128xf32> -> vector<16x128xf32>
    %c0_70 = arith.constant 0 : index
    %c0_71 = arith.constant 0 : index
    %165 = vector.load %arg3[%c0_70, %c0_71] : memref<1x128xf32, #tpu.memory_space<vmem>>, vector<1x128xf32>
    %166 = vector.broadcast %165 : vector<1x128xf32> to vector<16x128xf32>
    %167 = arith.addf %164, %166 : vector<16x128xf32>
    %c0_72 = arith.constant 0 : index
    %c0_73 = arith.constant 0 : index
    %168 = vector.load %arg4[%c0_72, %c0_73] : memref<16x128xf32, #tpu.memory_space<vmem>>, vector<16x128xf32>
    tpu.vector_store %arg4[%c0_72, %c0_73], %167 {strides = array<i32>} : memref<16x128xf32, #tpu.memory_space<vmem>>, vector<16x128xf32>,
    return
  }
}

</mosaic_0001>

<bundles_post_ra>
// kernel: tpu_custom_call.1
= control target key start
LH: loop header
LB: loop body
LE: loop exit
PB: predicated region body
PF: predicated region fallthrough
CT: control target
= control target key end

     0   :  { %9 = vsyncpa [#allocation4], 0  ;;  %s3225_s0 = inlined_call_operand.hbm [shape: f32[16,512], index: 0, kind: input, shape index: {}]   ;;  %s3226_s1 = inlined_call_operand.hbm [shape: f32[128,512], index: 1, kind: input, shape index: {}]   ;;  %s3227_s2 = inlined_call_operand.hbm [shape: f32[128,128], index: 2, kind: input, shape index: {}]   ;;  %s3228_s3 = inlined_call_operand.vmem [shape: f32[1,128], index: 3, kind: input, shape index: {}]   ;;  %s3229_s4 = inlined_call_operand.hbm [shape: f32[16,128], index: 4, kind: output, shape index: {}]  }
   0x1   :  { %10 = vsyncpa [#allocation7], 0 }
   0x2   :  { %11 = vsyncpa [#allocation5], 0  ;;  %s2356_s15 = smov [#allocation6]   ;;  %s2357_s17 = smov [#allocation3]  }
   0x3   :  { %s29_s16 = sshll.u32 %s2356_s15, 4  ;;  %s17_s18 = sshll.u32 %s2357_s17, 4  ;;  %s30_s16 = int_to_ptr.vmem [resolvable:$true] %s29_s16  ;;  %s18_s18 = int_to_ptr.vmem [resolvable:$true] %s17_s18 }
   0x4   :  { %s2278_s19 = scalar_lea.vmem %s30_s16, 8192  ;;  %p2283_p1 = scmp.lt.s32.totalorder %s30_s16, %s30_s16 }
   0x5   :  { %p2279_p0 = scmp.ne.s32.totalorder %s30_s16, %s2278_s19  ;;  %p2284_p2 = scmp.lt.s32.totalorder %s2278_s19, %s2278_s19 }
   0x7   :  { %p2285_p3 = por %p2284_p2, %p2283_p1 }
   0x9   :  { %p2286_p4 = pnand %p2285_p3, %p2279_p0 }
   0xb   :  { %2289 = shalt.err (!%p2286_p4)
}
   0xc   :  { %s2358_s20 = smov 512   ;;  %s2359_s21 = smov 32  }
   0xd   :  { %35 = dma.hbm_to_vmem [thread:$0]  %s3226_s1, 8192, %s30_s16, [#allocation7], %s2358_s20, %s2358_s20, %s2359_s21  }
   0xe   :  { %s2298_s24 = scalar_lea.vmem %s18_s18, 1024  ;;  %p2303_p6 = scmp.lt.s32.totalorder %s18_s18, %s18_s18 }
   0xf   :  { %p2299_p5 = scmp.ne.s32.totalorder %s18_s18, %s2298_s24  ;;  %p2304_p7 = scmp.lt.s32.totalorder %s2298_s24, %s2298_s24 }
  0x11   :  { %p2305_p8 = por %p2304_p7, %p2303_p6 }
  0x13   :  { %p2306_p9 = pnand %p2305_p8, %p2299_p5 }
  0x15   :  { %2309 = shalt.err (!%p2306_p9)
}
  0x16   :  { %23 = dma.hbm_to_vmem [thread:$0]  %s3225_s0, 1024, %s18_s18, [#allocation4], %s2358_s20, %s2358_s20, %s2359_s21  }
  0x17   :  { %s2360_s27 = smov [#allocation8]  }
  0x18   :  { %s41_s28 = sshll.u32 %s2360_s27, 4  ;;  %s42_s28 = int_to_ptr.vmem [resolvable:$true] %s41_s28 }
  0x19   :  { %s2318_s29 = scalar_lea.vmem %s42_s28, 2048  ;;  %p2323_p11 = scmp.lt.s32.totalorder %s42_s28, %s42_s28 }
  0x1a   :  { %p2319_p10 = scmp.ne.s32.totalorder %s42_s28, %s2318_s29  ;;  %p2324_p12 = scmp.lt.s32.totalorder %s2318_s29, %s2318_s29 }
  0x1c   :  { %p2325_p13 = por %p2324_p12, %p2323_p11 }
  0x1e   :  { %p2326_p0 = pnand %p2325_p13, %p2319_p10 }
  0x20   :  { %2329 = shalt.err (!%p2326_p0)
}
  0x21   :  { %s2361_s1 = smov 128   ;;  %s2362_s30 = smov 8  }
  0x22   :  { %47 = dma.hbm_to_vmem [thread:$0]  %s3227_s2, 2048, %s42_s28, [#allocation7], %s2361_s1, %s2361_s1, %s2362_s30  }
  0x23   :  { %2350 = dma.done.wait [#allocation4], 1024  }
  0x24   :  { %2351 = vsyncadd [#allocation4], 4294966272 }
  0x25   :  { %2352 = dma.done.wait [#allocation7], 10240  }
  0x26   :  { %2353 = vsyncadd [#allocation7], 4294957056  ;;  %v3230_v0 = vmov 0.0   ;;  %v2404_v1 = vld [vmem:[#allocation6 + $0x1e8] sm:$0xff]  ;;  %v2406_v2 = vld [vmem:[#allocation6 + $0x1e0] sm:$0xff]  ;;  %s2364_s7 = smov [#allocation9]  }
  0x27   :  { %191 = vmatprep.mubr.f32.mxu0 %v3230_v0  ;;  %262 = vmatprep.mubr.f32.mxu1 %v3230_v0  ;;  %3321 = vst [vmem:[#allocation13_spill] sm:$0xff] %v2404_v1  ;;  %v2408_v3 = vld [vmem:[#allocation6 + $0x1c8] sm:$0xff]  ;;  %v2411_v4 = vld [vmem:[#allocation6 + $0x1f8] sm:$0xff]  ;;  %v2413_v5 = vld [vmem:[#allocation6 + $0x1c0] sm:$0xff]  ;;  %s2114_s8 = sshll.u32 %s2364_s7, 4  ;;  %s2115_s8 = int_to_ptr.vmem [resolvable:$true] %s2114_s8 }
  0x28   :  { %127 = vmatprep.subr.mxu0 %v2404_v1  ;;  %3322 = vst [vmem:[#allocation14_spill] sm:$0xff] %v2411_v4  ;;  %v2415_v6 = vld [vmem:[#allocation6 + $0x1f0] sm:$0xff]  ;;  %198 = vmatprep.subr.mxu1 %v2411_v4  ;;  %v2419_v7 = vld [vmem:[#allocation6 + $0x1a8] sm:$0xff]  ;;  %v2421_v8 = vld [vmem:[#allocation6 + $0x1d8] sm:$0xff]  ;;  %s2330_s9 = scalar_lea.vmem %s2115_s8, 256  ;;  %p2335_p2 = scmp.lt.s32.totalorder %s2115_s8, %s2115_s8 }
  0x29   :  { %128 = vmatpush1.msra.mxu0 %v2406_v2  ;;  %199 = vmatpush1.msra.mxu1 %v2415_v6  ;;  %v2425_v9 = vld [vmem:[#allocation6 + $0x1a0] sm:$0xff]  ;;  %v2427_v10 = vld [vmem:[#allocation6 + $0x1d0] sm:$0xff]  ;;  %v2429_v11 = vld [vmem:[#allocation6 + $0x1b8] sm:$0xff]  ;;  %p2331_p1 = scmp.ne.s32.totalorder %s2115_s8, %s2330_s9  ;;  %p2336_p3 = scmp.lt.s32.totalorder %s2330_s9, %s2330_s9 }
  0x2a   :  { %129 = vmatprep.subr.mxu0 %v2408_v3  ;;  %200 = vmatprep.subr.mxu1 %v2421_v8  ;;  %v2433_v12 = vld [vmem:[#allocation6 + $0x188] sm:$0xff]  ;;  %v2435_v13 = vld [vmem:[#allocation6 + $0x1b0] sm:$0xff]  ;;  %v2439_v14 = vld [vmem:[#allocation6 + $0x180] sm:$0xff] }
  0x2b   :  { %130 = vmatpush1.msra.mxu0 %v2413_v5  ;;  %201 = vmatpush1.msra.mxu1 %v2427_v10  ;;  %v2441_v15 = vld [vmem:[#allocation6 + $0x198] sm:$0xff]  ;;  %v2445_v16 = vld [vmem:[#allocation6 + $0x168] sm:$0xff]  ;;  %v2447_v17 = vld [vmem:[#allocation6 + $0x190] sm:$0xff]  ;;  %p2337_p4 = por %p2336_p3, %p2335_p2 }
  0x2c   :  { %131 = vmatprep.subr.mxu0 %v2419_v7  ;;  %202 = vmatprep.subr.mxu1 %v2429_v11  ;;  %v2451_v18 = vld [vmem:[#allocation6 + $0x160] sm:$0xff]  ;;  %v2453_v19 = vld [vmem:[#allocation6 + $0x178] sm:$0xff]  ;;  %v2457_v20 = vld [vmem:[#allocation6 + $0x148] sm:$0xff] }
  0x2d   :  { %132 = vmatpush1.msra.mxu0 %v2425_v9  ;;  %203 = vmatpush1.msra.mxu1 %v2435_v13  ;;  %v2459_v21 = vld [vmem:[#allocation6 + $0x170] sm:$0xff]  ;;  %v2463_v22 = vld [vmem:[#allocation6 + $0x140] sm:$0xff]  ;;  %v2465_v23 = vld [vmem:[#allocation6 + $0x158] sm:$0xff]  ;;  %p2338_p5 = pnand %p2337_p4, %p2331_p1 }
  0x2e   :  { %133 = vmatprep.subr.mxu0 %v2433_v12  ;;  %204 = vmatprep.subr.mxu1 %v2441_v15  ;;  %v2469_v24 = vld [vmem:[#allocation6 + $0x128] sm:$0xff]  ;;  %v2471_v25 = vld [vmem:[#allocation6 + $0x150] sm:$0xff]  ;;  %v2475_v26 = vld [vmem:[#allocation6 + $0x120] sm:$0xff] }
  0x2f   :  { %134 = vmatpush1.msra.mxu0 %v2439_v14  ;;  %205 = vmatpush1.msra.mxu1 %v2447_v17  ;;  %v2477_v27 = vld [vmem:[#allocation6 + $0x138] sm:$0xff]  ;;  %v2481_v28 = vld [vmem:[#allocation6 + $0x108] sm:$0xff]  ;;  %v2483_v29 = vld [vmem:[#allocation6 + $0x130] sm:$0xff] }
  0x30   :  { %135 = vmatprep.subr.mxu0 %v2445_v16  ;;  %206 = vmatprep.subr.mxu1 %v2453_v19  ;;  %v2487_v30 = vld [vmem:[#allocation6 + $0x100] sm:$0xff]  ;;  %v2489_v31 = vld [vmem:[#allocation6 + $0x118] sm:$0xff]  ;;  %v2493_v32 = vld [vmem:[#allocation6 + $0xe8] sm:$0xff] }
  0x31   :  { %136 = vmatpush1.msra.mxu0 %v2451_v18  ;;  %207 = vmatpush1.msra.mxu1 %v2459_v21  ;;  %v2495_v33 = vld [vmem:[#allocation6 + $0x110] sm:$0xff]  ;;  %v2499_v34 = vld [vmem:[#allocation6 + $0xe0] sm:$0xff]  ;;  %v2501_v35 = vld [vmem:[#allocation6 + $0xf8] sm:$0xff] }
  0x32   :  { %137 = vmatprep.subr.mxu0 %v2457_v20  ;;  %208 = vmatprep.subr.mxu1 %v2465_v23  ;;  %v2505_v36 = vld [vmem:[#allocation6 + $0xc8] sm:$0xff]  ;;  %v2507_v37 = vld [vmem:[#allocation6 + $0xf0] sm:$0xff]  ;;  %v2511_v38 = vld [vmem:[#allocation6 + $0xc0] sm:$0xff] }
  0x33   :  { %138 = vmatpush1.msra.mxu0 %v2463_v22  ;;  %209 = vmatpush1.msra.mxu1 %v2471_v25  ;;  %v2513_v39 = vld [vmem:[#allocation6 + $0xd8] sm:$0xff]  ;;  %v2517_v40 = vld [vmem:[#allocation6 + $0xa8] sm:$0xff]  ;;  %v2519_v41 = vld [vmem:[#allocation6 + $0xd0] sm:$0xff] }
  0x34   :  { %139 = vmatprep.subr.mxu0 %v2469_v24  ;;  %210 = vmatprep.subr.mxu1 %v2477_v27  ;;  %v2523_v42 = vld [vmem:[#allocation6 + $0xa0] sm:$0xff]  ;;  %v2525_v43 = vld [vmem:[#allocation6 + $0xb8] sm:$0xff]  ;;  %v2529_v44 = vld [vmem:[#allocation6 + $0x88] sm:$0xff] }
  0x35   :  { %140 = vmatpush1.msra.mxu0 %v2475_v26  ;;  %211 = vmatpush1.msra.mxu1 %v2483_v29  ;;  %3323 = vst [vmem:[#allocation15_spill] sm:$0xff] %v2529_v44  ;;  %v2531_v45 = vld [vmem:[#allocation6 + $0xb0] sm:$0xff]  ;;  %v2535_v46 = vld [vmem:[#allocation6 + $0x80] sm:$0xff]  ;;  %v2537_v47 = vld [vmem:[#allocation6 + $0x98] sm:$0xff] }
  0x36   :  { %141 = vmatprep.subr.mxu0 %v2481_v28  ;;  %212 = vmatprep.subr.mxu1 %v2489_v31  ;;  %3324 = vst [vmem:[#allocation16_spill] sm:$0xff] %v2535_v46  ;;  %3325 = vst [vmem:[#allocation17_spill] sm:$0xff] %v2537_v47  ;;  %v2541_v48 = vld [vmem:[#allocation6 + $0x68] sm:$0xff]  ;;  %v2543_v49 = vld [vmem:[#allocation6 + $0x90] sm:$0xff] }
  0x37   :  { %142 = vmatpush1.msra.mxu0 %v2487_v30  ;;  %213 = vmatpush1.msra.mxu1 %v2495_v33  ;;  %3326 = vst [vmem:[#allocation18_spill] sm:$0xff] %v2541_v48  ;;  %3327 = vst [vmem:[#allocation19_spill] sm:$0xff] %v2543_v49  ;;  %v2547_v50 = vld [vmem:[#allocation6 + $0x60] sm:$0xff]  ;;  %v2549_v51 = vld [vmem:[#allocation6 + $0x78] sm:$0xff] }
  0x38   :  { %143 = vmatprep.subr.mxu0 %v2493_v32  ;;  %214 = vmatprep.subr.mxu1 %v2501_v35  ;;  %3328 = vst [vmem:[#allocation20_spill] sm:$0xff] %v2547_v50  ;;  %3329 = vst [vmem:[#allocation21_spill] sm:$0xff] %v2549_v51  ;;  %v2553_v52 = vld [vmem:[#allocation6 + $0x48] sm:$0xff]  ;;  %v2555_v53 = vld [vmem:[#allocation6 + $0x70] sm:$0xff] }
  0x39   :  { %144 = vmatpush1.msra.mxu0 %v2499_v34  ;;  %215 = vmatpush1.msra.mxu1 %v2507_v37  ;;  %3330 = vst [vmem:[#allocation22_spill] sm:$0xff] %v2553_v52  ;;  %3331 = vst [vmem:[#allocation23_spill] sm:$0xff] %v2555_v53  ;;  %v2559_v54 = vld [vmem:[#allocation6 + $0x40] sm:$0xff]  ;;  %v2561_v55 = vld [vmem:[#allocation6 + $0x58] sm:$0xff] }
  0x3a   :  { %145 = vmatprep.subr.mxu0 %v2505_v36  ;;  %216 = vmatprep.subr.mxu1 %v2513_v39  ;;  %3332 = vst [vmem:[#allocation24_spill] sm:$0xff] %v2559_v54  ;;  %3333 = vst [vmem:[#allocation25_spill] sm:$0xff] %v2561_v55  ;;  %v2565_v56 = vld [vmem:[#allocation6 + $0x28] sm:$0xff]  ;;  %v2567_v57 = vld [vmem:[#allocation6 + $0x50] sm:$0xff] }
  0x3b   :  { %146 = vmatpush1.msra.mxu0 %v2511_v38  ;;  %217 = vmatpush1.msra.mxu1 %v2519_v41  ;;  %3334 = vst [vmem:[#allocation26_spill] sm:$0xff] %v2565_v56  ;;  %3335 = vst [vmem:[#allocation27_spill] sm:$0xff] %v2567_v57  ;;  %v2571_v58 = vld [vmem:[#allocation6 + $0x20] sm:$0xff]  ;;  %v2573_v59 = vld [vmem:[#allocation6 + $0x38] sm:$0xff] }
  0x3c   :  { %147 = vmatprep.subr.mxu0 %v2517_v40  ;;  %218 = vmatprep.subr.mxu1 %v2525_v43  ;;  %3336 = vst [vmem:[#allocation28_spill] sm:$0xff] %v2571_v58  ;;  %3337 = vst [vmem:[#allocation29_spill] sm:$0xff] %v2573_v59  ;;  %v2577_v60 = vld [vmem:[#allocation6 + $0x8] sm:$0xff]  ;;  %v2579_v61 = vld [vmem:[#allocation6 + $0x30] sm:$0xff] }
  0x3d   :  { %148 = vmatpush1.msra.mxu0 %v2523_v42  ;;  %219 = vmatpush1.msra.mxu1 %v2531_v45  ;;  %3338 = vst [vmem:[#allocation30_spill] sm:$0xff] %v2577_v60  ;;  %3339 = vst [vmem:[#allocation31_spill] sm:$0xff] %v2579_v61  ;;  %v2583_v62 = vld [vmem:[#allocation6] sm:$0xff]  ;;  %v2585_v63 = vld [vmem:[#allocation6 + $0x18] sm:$0xff] }
  0x3e   :  { %149 = vmatprep.subr.mxu0 %v2529_v44  ;;  %220 = vmatprep.subr.mxu1 %v2537_v47  ;;  %3340 = vst [vmem:[#allocation32_spill] sm:$0xff] %v2583_v62  ;;  %3341 = vst [vmem:[#allocation33_spill] sm:$0xff] %v2585_v63  ;;  %v2589_v0 = vld [vmem:[#allocation6 + $0x10] sm:$0xff] }
  0x3f   :  { %150 = vmatpush1.msra.mxu0 %v2535_v46  ;;  %221 = vmatpush1.msra.mxu1 %v2543_v49  ;;  %3342 = vst [vmem:[#allocation34_spill] sm:$0xff] %v2589_v0 }
  0x40   :  { %151 = vmatprep.subr.mxu0 %v2541_v48  ;;  %222 = vmatprep.subr.mxu1 %v2549_v51 }
  0x41   :  { %152 = vmatpush1.msra.mxu0 %v2547_v50  ;;  %223 = vmatpush1.msra.mxu1 %v2555_v53 }
  0x42   :  { %153 = vmatprep.subr.mxu0 %v2553_v52  ;;  %224 = vmatprep.subr.mxu1 %v2561_v55 }
  0x43   :  { %154 = vmatpush1.msra.mxu0 %v2559_v54  ;;  %225 = vmatpush1.msra.mxu1 %v2567_v57 }
  0x44   :  { %155 = vmatprep.subr.mxu0 %v2565_v56  ;;  %226 = vmatprep.subr.mxu1 %v2573_v59  ;;  %v3343_v56 = vmov 0.0  }
  0x45   :  { %156 = vmatpush1.msra.mxu0 %v2571_v58  ;;  %227 = vmatpush1.msra.mxu1 %v2579_v61 }
  0x46   :  { %157 = vmatprep.subr.mxu0 %v2577_v60  ;;  %228 = vmatprep.subr.mxu1 %v2585_v63 }
  0x47   :  { %158 = vmatpush1.msra.mxu0 %v2583_v62  ;;  %229 = vmatpush1.msra.mxu1 %v2589_v0 }
  0x48   :  { %192 = vmatmul.mubr.f32.vlgmr.msra.gmra.mxu0 %v3343_v56  ;;  %263 = vmatmul.mubr.f32.vlgmr.msra.gmra.mxu1 %v3343_v56 }
  0x49   :  { %357 = vmatprep.subr.mxu0 %v2404_v1  ;;  %428 = vmatprep.subr.mxu1 %v2411_v4 }
  0x4a   :  { %358 = vmatpush1.msra.mxu0 %v2406_v2  ;;  %429 = vmatpush1.msra.mxu1 %v2415_v6 }
  0x4b   :  { %359 = vmatprep.subr.mxu0 %v2408_v3  ;;  %430 = vmatprep.subr.mxu1 %v2421_v8 }
  0x4c   :  { %360 = vmatpush1.msra.mxu0 %v2413_v5  ;;  %431 = vmatpush1.msra.mxu1 %v2427_v10 }
  0x4d   :  { %361 = vmatprep.subr.mxu0 %v2419_v7  ;;  %432 = vmatprep.subr.mxu1 %v2429_v11 }
  0x4e   :  { %362 = vmatpush1.msra.mxu0 %v2425_v9  ;;  %433 = vmatpush1.msra.mxu1 %v2435_v13 }
  0x4f   :  { %363 = vmatprep.subr.mxu0 %v2433_v12  ;;  %434 = vmatprep.subr.mxu1 %v2441_v15 }
  0x50   :  { %364 = vmatpush1.msra.mxu0 %v2439_v14  ;;  %435 = vmatpush1.msra.mxu1 %v2447_v17 }
  0x51   :  { %365 = vmatprep.subr.mxu0 %v2445_v16  ;;  %436 = vmatprep.subr.mxu1 %v2453_v19 }
  0x52   :  { %366 = vmatpush1.msra.mxu0 %v2451_v18  ;;  %437 = vmatpush1.msra.mxu1 %v2459_v21 }
  0x53   :  { %367 = vmatprep.subr.mxu0 %v2457_v20  ;;  %438 = vmatprep.subr.mxu1 %v2465_v23 }
  0x54   :  { %368 = vmatpush1.msra.mxu0 %v2463_v22  ;;  %439 = vmatpush1.msra.mxu1 %v2471_v25 }
  0x55   :  { %369 = vmatprep.subr.mxu0 %v2469_v24  ;;  %440 = vmatprep.subr.mxu1 %v2477_v27 }
  0x56   :  { %370 = vmatpush1.msra.mxu0 %v2475_v26  ;;  %441 = vmatpush1.msra.mxu1 %v2483_v29 }
  0x57   :  { %371 = vmatprep.subr.mxu0 %v2481_v28  ;;  %442 = vmatprep.subr.mxu1 %v2489_v31 }
  0x58   :  { %372 = vmatpush1.msra.mxu0 %v2487_v30  ;;  %443 = vmatpush1.msra.mxu1 %v2495_v33 }
  0x59   :  { %373 = vmatprep.subr.mxu0 %v2493_v32  ;;  %444 = vmatprep.subr.mxu1 %v2501_v35 }
  0x5a   :  { %374 = vmatpush1.msra.mxu0 %v2499_v34  ;;  %445 = vmatpush1.msra.mxu1 %v2507_v37 }
  0x5b   :  { %375 = vmatprep.subr.mxu0 %v2505_v36  ;;  %446 = vmatprep.subr.mxu1 %v2513_v39 }
  0x5c   :  { %376 = vmatpush1.msra.mxu0 %v2511_v38  ;;  %447 = vmatpush1.msra.mxu1 %v2519_v41 }
  0x5d   :  { %377 = vmatprep.subr.mxu0 %v2517_v40  ;;  %448 = vmatprep.subr.mxu1 %v2525_v43 }
  0x5e   :  { %378 = vmatpush1.msra.mxu0 %v2523_v42  ;;  %449 = vmatpush1.msra.mxu1 %v2531_v45 }
  0x5f   :  { %379 = vmatprep.subr.mxu0 %v2529_v44  ;;  %450 = vmatprep.subr.mxu1 %v2537_v47  ;;  %v3344_v47 = vld [vmem:[#allocation26_spill] sm:$0xff] }
  0x60   :  { %380 = vmatpush1.msra.mxu0 %v2535_v46  ;;  %451 = vmatpush1.msra.mxu1 %v2543_v49 }
  0x61   :  { %381 = vmatprep.subr.mxu0 %v2541_v48  ;;  %452 = vmatprep.subr.mxu1 %v2549_v51 }
  0x62   :  { %382 = vmatpush1.msra.mxu0 %v2547_v50  ;;  %453 = vmatpush1.msra.mxu1 %v2555_v53 }
  0x63   :  { %383 = vmatprep.subr.mxu0 %v2553_v52  ;;  %454 = vmatprep.subr.mxu1 %v2561_v55 }
  0x64   :  { %384 = vmatpush1.msra.mxu0 %v2559_v54  ;;  %455 = vmatpush1.msra.mxu1 %v2567_v57 }
  0x65   :  { %385 = vmatprep.subr.mxu0 %v3344_v47  ;;  %456 = vmatprep.subr.mxu1 %v2573_v59  ;;  %v59_v59 = vld [vmem:[#allocation3] sm:$0x3]  ;;  %v60_v47 = vld [vmem:[#allocation3 + $0x8] sm:$0x3] }
  0x66   :  { %386 = vmatpush1.msra.mxu0 %v2571_v58  ;;  %457 = vmatpush1.msra.mxu1 %v2579_v61 }
  0x67   :  { %387 = vmatprep.subr.mxu0 %v2577_v60  ;;  %458 = vmatprep.subr.mxu1 %v2585_v63  ;;  %v62_v60 = vld [vmem:[#allocation3 + $0x18] sm:$0x3] }
  0x68   :  { %388 = vmatpush1.msra.mxu0 %v2583_v62  ;;  %421 = vmatprep.mubr.f32.mxu0 %v3343_v56 }
  0x69   :  { %459 = vmatpush1.msra.mxu1 %v2589_v0  ;;  %492 = vmatprep.mubr.f32.mxu1 %v3343_v56  ;;  %v61_v0 = vld [vmem:[#allocation3 + $0x10] sm:$0x3] }
  0x6a   :  { %605 = vmatprep.subr.mxu0 %v2404_v1  ;;  %676 = vmatprep.subr.mxu1 %v2411_v4 }
 0x108   :  { %v193_v58 = vpop.f32.mrf.mxu0  ;;  %v264_v57 = vpop.f32.mrf.mxu1 }
 0x109   :  { %v269_v61 = vadd.f32 %v193_v58, %v59_v59  ;;  %v271_v52 = vadd.f32 %v264_v57, %v61_v0  ;;  %v3345_v0 = vld [vmem:[#allocation17_spill] sm:$0xff]  ;;  %v3354_v57 = vld [vmem:[#allocation27_spill] sm:$0xff] }
 0x10a   :  { %v195_v54 = vpop.f32.mrf.mxu0  ;;  %v266_v62 = vpop.f32.mrf.mxu1 }
 0x10b   :  { %2190 = vtanh.f32 %v269_v61  ;;  %v270_v63 = vadd.f32 %v195_v54, %v60_v47  ;;  %v272_v55 = vadd.f32 %v266_v62, %v62_v60  ;;  %v3355_v62 = vld [vmem:[#allocation26_spill] sm:$0xff] }
 0x10d   :  { %2192 = vtanh.f32 %v270_v63  ;;  %v3356_v63 = vld [vmem:[#allocation29_spill] sm:$0xff] }
 0x10e   :  { %2194 = vtanh.f32 %v272_v55 }
 0x10f   :  { %2196 = vtanh.f32 %v271_v52  ;;  %v3351_v52 = vld [vmem:[#allocation22_spill] sm:$0xff] }
 0x118   :  { %v2191_v56 = vpop.eup %2190 }
 0x119   :  { %v277_v53 = vmul.f32 0.5, %v2191_v56  ;;  %v3353_v56 = vld [vmem:[#allocation24_spill] sm:$0xff] }
 0x11a   :  { %v2193_v1 = vpop.eup %2192 }
 0x11b   :  { %v280_v50 = vadd.f32 0.5, %v277_v53  ;;  %v278_v4 = vmul.f32 0.5, %v2193_v1  ;;  %v2195_v51 = vpop.eup %2194  ;;  %v3346_v1 = vld [vmem:[#allocation19_spill] sm:$0xff]  ;;  %v3352_v53 = vld [vmem:[#allocation25_spill] sm:$0xff] }
 0x11c   :  { %v2197_v47 = vpop.eup %2196 }
 0x11d   :  { %v281_v48 = vadd.f32 0.5, %v278_v4  ;;  %v284_v59 = vmul.f32 %v2195_v51, %v280_v50  ;;  %v279_v54 = vmul.f32 0.5, %v2197_v47  ;;  %v3347_v4 = vld [vmem:[#allocation18_spill] sm:$0xff]  ;;  %v3349_v50 = vld [vmem:[#allocation20_spill] sm:$0xff]  ;;  %v3350_v51 = vld [vmem:[#allocation23_spill] sm:$0xff] }
 0x11e   :  { %v3359_v47 = vld [vmem:[#allocation30_spill] sm:$0xff] }
 0x11f   :  { %v283_v58 = vmul.f32 0.0, %v281_v48  ;;  %v282_v60 = vadd.f32 0.5, %v279_v54  ;;  %v3348_v48 = vld [vmem:[#allocation21_spill] sm:$0xff] }
 0x120   :  { %v3360_v54 = vld [vmem:[#allocation33_spill] sm:$0xff] }
 0x121   :  { %v2666_v49 = vadd.f32 %v284_v59, %v283_v58  ;;  %v3357_v58 = vld [vmem:[#allocation28_spill] sm:$0xff]  ;;  %v3358_v59 = vld [vmem:[#allocation31_spill] sm:$0xff] }
 0x123   :  { %2198 = vtanh.f32 %v2666_v49 }
 0x130   :  { %v2199_v55 = vpop.eup %2198 }
 0x131   :  { %v287_v61 = vmul.f32 %v2199_v55, %v282_v60  ;;  %v3361_v60 = vld [vmem:[#allocation32_spill] sm:$0xff]  ;;  %v3362_v55 = vmov 0.0  }
 0x133   :  { %288 = vst [vmem:[#allocation2] sm:$0x3] %v287_v61  ;;  %422 = vmatmul.mubr.f32.vlgmr.msra.gmra.mxu0 %v287_v61  ;;  %493 = vmatmul.mubr.f32.vlgmr.msra.gmra.mxu1 %v287_v61  ;;  %v3363_v61 = vld [vmem:[#allocation34_spill] sm:$0xff] }
 0x134   :  { %606 = vmatpush1.msra.mxu0 %v2406_v2  ;;  %677 = vmatpush1.msra.mxu1 %v2415_v6 }
 0x135   :  { %607 = vmatprep.subr.mxu0 %v2408_v3  ;;  %678 = vmatprep.subr.mxu1 %v2421_v8 }
 0x136   :  { %608 = vmatpush1.msra.mxu0 %v2413_v5  ;;  %679 = vmatpush1.msra.mxu1 %v2427_v10 }
 0x137   :  { %609 = vmatprep.subr.mxu0 %v2419_v7  ;;  %680 = vmatprep.subr.mxu1 %v2429_v11 }
 0x138   :  { %610 = vmatpush1.msra.mxu0 %v2425_v9  ;;  %681 = vmatpush1.msra.mxu1 %v2435_v13 }
 0x139   :  { %611 = vmatprep.subr.mxu0 %v2433_v12  ;;  %682 = vmatprep.subr.mxu1 %v2441_v15 }
 0x13a   :  { %612 = vmatpush1.msra.mxu0 %v2439_v14  ;;  %683 = vmatpush1.msra.mxu1 %v2447_v17 }
 0x13b   :  { %613 = vmatprep.subr.mxu0 %v2445_v16  ;;  %684 = vmatprep.subr.mxu1 %v2453_v19 }
 0x13c   :  { %614 = vmatpush1.msra.mxu0 %v2451_v18  ;;  %685 = vmatpush1.msra.mxu1 %v2459_v21 }
 0x13d   :  { %615 = vmatprep.subr.mxu0 %v2457_v20  ;;  %686 = vmatprep.subr.mxu1 %v2465_v23 }
 0x13e   :  { %616 = vmatpush1.msra.mxu0 %v2463_v22  ;;  %687 = vmatpush1.msra.mxu1 %v2471_v25 }
 0x13f   :  { %617 = vmatprep.subr.mxu0 %v2469_v24  ;;  %688 = vmatprep.subr.mxu1 %v2477_v27 }
 0x140   :  { %618 = vmatpush1.msra.mxu0 %v2475_v26  ;;  %689 = vmatpush1.msra.mxu1 %v2483_v29 }
 0x141   :  { %619 = vmatprep.subr.mxu0 %v2481_v28  ;;  %690 = vmatprep.subr.mxu1 %v2489_v31 }
 0x142   :  { %620 = vmatpush1.msra.mxu0 %v2487_v30  ;;  %691 = vmatpush1.msra.mxu1 %v2495_v33 }
 0x143   :  { %621 = vmatprep.subr.mxu0 %v2493_v32  ;;  %692 = vmatprep.subr.mxu1 %v2501_v35 }
 0x144   :  { %622 = vmatpush1.msra.mxu0 %v2499_v34  ;;  %693 = vmatpush1.msra.mxu1 %v2507_v37 }
 0x145   :  { %623 = vmatprep.subr.mxu0 %v2505_v36  ;;  %694 = vmatprep.subr.mxu1 %v2513_v39 }
 0x146   :  { %624 = vmatpush1.msra.mxu0 %v2511_v38  ;;  %695 = vmatpush1.msra.mxu1 %v2519_v41 }
 0x147   :  { %625 = vmatprep.subr.mxu0 %v2517_v40  ;;  %696 = vmatprep.subr.mxu1 %v2525_v43 }
 0x148   :  { %626 = vmatpush1.msra.mxu0 %v2523_v42  ;;  %697 = vmatpush1.msra.mxu1 %v2531_v45 }
 0x149   :  { %627 = vmatprep.subr.mxu0 %v2529_v44  ;;  %698 = vmatprep.subr.mxu1 %v3345_v0 }
 0x14a   :  { %628 = vmatpush1.msra.mxu0 %v2535_v46  ;;  %699 = vmatpush1.msra.mxu1 %v3346_v1 }
 0x14b   :  { %629 = vmatprep.subr.mxu0 %v3347_v4  ;;  %700 = vmatprep.subr.mxu1 %v3348_v48 }
 0x14c   :  { %630 = vmatpush1.msra.mxu0 %v3349_v50  ;;  %701 = vmatpush1.msra.mxu1 %v3350_v51  ;;  %v292_v50 = vld [vmem:[#allocation3 + $0x18] sm:$0xc] }
 0x14d   :  { %631 = vmatprep.subr.mxu0 %v3351_v52  ;;  %702 = vmatprep.subr.mxu1 %v3352_v53  ;;  %v290_v53 = vld [vmem:[#allocation3 + $0x8] sm:$0xc] }
 0x14e   :  { %632 = vmatpush1.msra.mxu0 %v3353_v56  ;;  %703 = vmatpush1.msra.mxu1 %v3354_v57  ;;  %v3364_v57 = vld [vmem:[#allocation13_spill] sm:$0xff] }
 0x14f   :  { %633 = vmatprep.subr.mxu0 %v3355_v62  ;;  %704 = vmatprep.subr.mxu1 %v3356_v63  ;;  %v3365_v62 = vld [vmem:[#allocation14_spill] sm:$0xff]  ;;  %v289_v63 = vld [vmem:[#allocation3] sm:$0xc] }
 0x150   :  { %634 = vmatpush1.msra.mxu0 %v3357_v58  ;;  %705 = vmatpush1.msra.mxu1 %v3358_v59 }
 0x151   :  { %635 = vmatprep.subr.mxu0 %v3359_v47  ;;  %706 = vmatprep.subr.mxu1 %v3360_v54 }
 0x152   :  { %636 = vmatpush1.msra.mxu0 %v3361_v60  ;;  %669 = vmatprep.mubr.f32.mxu0 %v3362_v55 }
 0x153   :  { %707 = vmatpush1.msra.mxu1 %v3363_v61  ;;  %740 = vmatprep.mubr.f32.mxu1 %v3362_v55 }
 0x154   :  { %853 = vmatprep.subr.mxu0 %v3364_v57  ;;  %924 = vmatprep.subr.mxu1 %v3365_v62  ;;  %v291_v57 = vld [vmem:[#allocation3 + $0x10] sm:$0xc] }
 0x1f3   :  { %v423_v58 = vpop.f32.mrf.mxu0  ;;  %v494_v56 = vpop.f32.mrf.mxu1 }
 0x1f4   :  { %v503_v59 = vrot.slane %v423_v58, 6  ;;  %v505_v55 = vrot.slane %v494_v56, 6 }
 0x1f5   :  { %v425_v47 = vpop.f32.mrf.mxu0  ;;  %v496_v52 = vpop.f32.mrf.mxu1 }
 0x1f6   :  { %v511_v54 = vadd.f32 %v503_v59, %v289_v63  ;;  %v504_v51 = vrot.slane %v425_v47, 6  ;;  %v506_v60 = vrot.slane %v496_v52, 6  ;;  %v513_v4 = vadd.f32 %v505_v55, %v291_v57 }
 0x1f7   :  { %v526_v63 = vrot.slane %v2666_v49, 6 }
 0x1f8   :  { %2200 = vtanh.f32 %v511_v54  ;;  %v512_v48 = vadd.f32 %v504_v51, %v290_v53  ;;  %v514_v61 = vadd.f32 %v506_v60, %v292_v50 }
 0x1fa   :  { %2202 = vtanh.f32 %v512_v48 }
 0x1fb   :  { %2204 = vtanh.f32 %v514_v61 }
 0x1fc   :  { %2206 = vtanh.f32 %v513_v4 }
 0x205   :  { %v2201_v62 = vpop.eup %2200 }
 0x206   :  { %v519_v1 = vmul.f32 0.5, %v2201_v62 }
 0x207   :  { %v2203_v46 = vpop.eup %2202 }
 0x208   :  { %v522_v0 = vadd.f32 0.5, %v519_v1  ;;  %v520_v58 = vmul.f32 0.5, %v2203_v46  ;;  %v2205_v59 = vpop.eup %2204 }
 0x209   :  { %v2207_v48 = vpop.eup %2206 }
 0x20a   :  { %v523_v44 = vadd.f32 0.5, %v520_v58  ;;  %v529_v47 = vmul.f32 %v2205_v59, %v522_v0  ;;  %v521_v50 = vmul.f32 0.5, %v2207_v48  ;;  %v2809_v59 = vld [vmem:[#allocation6 + $0x1e8] sm:$0xff] }
 0x20b   :  { %3387 = vst [vmem:[#allocation13_spill] sm:$0xff] %v2809_v59  ;;  %v2821_v48 = vld [vmem:[#allocation6 + $0x1c8] sm:$0xff] }
 0x20c   :  { %v528_v52 = vmul.f32 %v526_v63, %v523_v44  ;;  %v524_v51 = vadd.f32 0.5, %v521_v50  ;;  %v2823_v50 = vld [vmem:[#allocation6 + $0x1d8] sm:$0xff] }
 0x20e   :  { %v2736_v54 = vadd.f32 %v529_v47, %v528_v52  ;;  %v2811_v52 = vld [vmem:[#allocation6 + $0x1f8] sm:$0xff]  ;;  %v2815_v47 = vld [vmem:[#allocation6 + $0x1e0] sm:$0xff] }
 0x20f   :  { %3388 = vst [vmem:[#allocation14_spill] sm:$0xff] %v2811_v52 }
 0x210   :  { %2208 = vtanh.f32 %v2736_v54  ;;  %v774_v46 = vrot.slane %v2736_v54, 6  ;;  %v2817_v54 = vld [vmem:[#allocation6 + $0x1f0] sm:$0xff] }
 0x21d   :  { %v2209_v53 = vpop.eup %2208 }
 0x21e   :  { %v532_v56 = vmul.f32 %v2209_v53, %v524_v51  ;;  %v2827_v51 = vld [vmem:[#allocation6 + $0x1c0] sm:$0xff]  ;;  %v2829_v53 = vld [vmem:[#allocation6 + $0x1d0] sm:$0xff] }
 0x220   :  { %533 = vst [vmem:[#allocation2] sm:$0xc] %v532_v56  ;;  %v603_v60 = vrot.slane %v532_v56, 2  ;;  %v2833_v56 = vld [vmem:[#allocation6 + $0x1a8] sm:$0xff] }
 0x222   :  { %670 = vmatmul.mubr.f32.vlgmr.msra.gmra.mxu0 %v603_v60  ;;  %741 = vmatmul.mubr.f32.vlgmr.msra.gmra.mxu1 %v603_v60  ;;  %v2835_v60 = vld [vmem:[#allocation6 + $0x1b8] sm:$0xff] }
 0x223   :  { %854 = vmatpush1.msra.mxu0 %v2406_v2  ;;  %925 = vmatpush1.msra.mxu1 %v2415_v6  ;;  %v3366_v2 = vld [vmem:[#allocation15_spill] sm:$0xff] }
 0x224   :  { %855 = vmatprep.subr.mxu0 %v2408_v3  ;;  %926 = vmatprep.subr.mxu1 %v2421_v8  ;;  %v3367_v3 = vld [vmem:[#allocation17_spill] sm:$0xff]  ;;  %v3369_v6 = vld [vmem:[#allocation19_spill] sm:$0xff] }
 0x225   :  { %856 = vmatpush1.msra.mxu0 %v2413_v5  ;;  %927 = vmatpush1.msra.mxu1 %v2427_v10  ;;  %v3368_v5 = vld [vmem:[#allocation16_spill] sm:$0xff]  ;;  %v3371_v8 = vld [vmem:[#allocation21_spill] sm:$0xff]  ;;  %v3373_v10 = vld [vmem:[#allocation23_spill] sm:$0xff] }
 0x226   :  { %857 = vmatprep.subr.mxu0 %v2419_v7  ;;  %928 = vmatprep.subr.mxu1 %v2429_v11  ;;  %v3370_v7 = vld [vmem:[#allocation18_spill] sm:$0xff] }
 0x227   :  { %858 = vmatpush1.msra.mxu0 %v2425_v9  ;;  %929 = vmatpush1.msra.mxu1 %v2435_v13  ;;  %v3372_v9 = vld [vmem:[#allocation20_spill] sm:$0xff]  ;;  %v3374_v11 = vld [vmem:[#allocation22_spill] sm:$0xff] }
 0x228   :  { %859 = vmatprep.subr.mxu0 %v2433_v12  ;;  %930 = vmatprep.subr.mxu1 %v2441_v15  ;;  %v3375_v12 = vld [vmem:[#allocation25_spill] sm:$0xff]  ;;  %v3376_v13 = vld [vmem:[#allocation24_spill] sm:$0xff]  ;;  %v3378_v15 = vld [vmem:[#allocation26_spill] sm:$0xff] }
 0x229   :  { %860 = vmatpush1.msra.mxu0 %v2439_v14  ;;  %931 = vmatpush1.msra.mxu1 %v2447_v17  ;;  %v3377_v14 = vld [vmem:[#allocation27_spill] sm:$0xff]  ;;  %v3380_v17 = vld [vmem:[#allocation28_spill] sm:$0xff] }
 0x22a   :  { %861 = vmatprep.subr.mxu0 %v2445_v16  ;;  %932 = vmatprep.subr.mxu1 %v2453_v19  ;;  %v3379_v16 = vld [vmem:[#allocation29_spill] sm:$0xff]  ;;  %v3382_v19 = vld [vmem:[#allocation30_spill] sm:$0xff] }
 0x22b   :  { %862 = vmatpush1.msra.mxu0 %v2451_v18  ;;  %933 = vmatpush1.msra.mxu1 %v2459_v21  ;;  %v3381_v18 = vld [vmem:[#allocation31_spill] sm:$0xff]  ;;  %v3384_v21 = vld [vmem:[#allocation32_spill] sm:$0xff] }
 0x22c   :  { %863 = vmatprep.subr.mxu0 %v2457_v20  ;;  %934 = vmatprep.subr.mxu1 %v2465_v23  ;;  %v3383_v20 = vld [vmem:[#allocation33_spill] sm:$0xff]  ;;  %v3386_v23 = vld [vmem:[#allocation34_spill] sm:$0xff] }
 0x22d   :  { %864 = vmatpush1.msra.mxu0 %v2463_v22  ;;  %935 = vmatpush1.msra.mxu1 %v2471_v25  ;;  %v3385_v22 = vmov 0.0  }
 0x22e   :  { %865 = vmatprep.subr.mxu0 %v2469_v24  ;;  %936 = vmatprep.subr.mxu1 %v2477_v27  ;;  %v534_v24 = vld [vmem:[#allocation3] sm:$0x30] }
 0x22f   :  { %866 = vmatpush1.msra.mxu0 %v2475_v26  ;;  %937 = vmatpush1.msra.mxu1 %v2483_v29 }
 0x230   :  { %867 = vmatprep.subr.mxu0 %v2481_v28  ;;  %938 = vmatprep.subr.mxu1 %v2489_v31  ;;  %v535_v28 = vld [vmem:[#allocation3 + $0x8] sm:$0x30] }
 0x231   :  { %868 = vmatpush1.msra.mxu0 %v2487_v30  ;;  %939 = vmatpush1.msra.mxu1 %v2495_v33 }
 0x232   :  { %869 = vmatprep.subr.mxu0 %v2493_v32  ;;  %940 = vmatprep.subr.mxu1 %v2501_v35 }
 0x233   :  { %870 = vmatpush1.msra.mxu0 %v2499_v34  ;;  %941 = vmatpush1.msra.mxu1 %v2507_v37  ;;  %v537_v34 = vld [vmem:[#allocation3 + $0x18] sm:$0x30] }
 0x234   :  { %871 = vmatprep.subr.mxu0 %v2505_v36  ;;  %942 = vmatprep.subr.mxu1 %v2513_v39 }
 0x235   :  { %872 = vmatpush1.msra.mxu0 %v2511_v38  ;;  %943 = vmatpush1.msra.mxu1 %v2519_v41  ;;  %v536_v38 = vld [vmem:[#allocation3 + $0x10] sm:$0x30] }
 0x236   :  { %873 = vmatprep.subr.mxu0 %v2517_v40  ;;  %944 = vmatprep.subr.mxu1 %v2525_v43 }
 0x237   :  { %874 = vmatpush1.msra.mxu0 %v2523_v42  ;;  %945 = vmatpush1.msra.mxu1 %v2531_v45 }
 0x238   :  { %875 = vmatprep.subr.mxu0 %v3366_v2  ;;  %946 = vmatprep.subr.mxu1 %v3367_v3  ;;  %v2839_v2 = vld [vmem:[#allocation6 + $0x1a0] sm:$0xff]  ;;  %v2841_v3 = vld [vmem:[#allocation6 + $0x1b0] sm:$0xff] }
 0x239   :  { %876 = vmatpush1.msra.mxu0 %v3368_v5  ;;  %947 = vmatpush1.msra.mxu1 %v3369_v6  ;;  %v2845_v5 = vld [vmem:[#allocation6 + $0x188] sm:$0xff]  ;;  %v2847_v6 = vld [vmem:[#allocation6 + $0x198] sm:$0xff] }
 0x23a   :  { %877 = vmatprep.subr.mxu0 %v3370_v7  ;;  %948 = vmatprep.subr.mxu1 %v3371_v8  ;;  %v2851_v7 = vld [vmem:[#allocation6 + $0x180] sm:$0xff]  ;;  %v2853_v8 = vld [vmem:[#allocation6 + $0x190] sm:$0xff] }
 0x23b   :  { %878 = vmatpush1.msra.mxu0 %v3372_v9  ;;  %949 = vmatpush1.msra.mxu1 %v3373_v10  ;;  %v2857_v9 = vld [vmem:[#allocation6 + $0x168] sm:$0xff]  ;;  %v2859_v10 = vld [vmem:[#allocation6 + $0x178] sm:$0xff] }
 0x23c   :  { %879 = vmatprep.subr.mxu0 %v3374_v11  ;;  %950 = vmatprep.subr.mxu1 %v3375_v12  ;;  %v2863_v11 = vld [vmem:[#allocation6 + $0x160] sm:$0xff]  ;;  %v2865_v12 = vld [vmem:[#allocation6 + $0x170] sm:$0xff] }
 0x23d   :  { %880 = vmatpush1.msra.mxu0 %v3376_v13  ;;  %951 = vmatpush1.msra.mxu1 %v3377_v14  ;;  %v2869_v13 = vld [vmem:[#allocation6 + $0x148] sm:$0xff]  ;;  %v2871_v14 = vld [vmem:[#allocation6 + $0x158] sm:$0xff] }
 0x23e   :  { %881 = vmatprep.subr.mxu0 %v3378_v15  ;;  %952 = vmatprep.subr.mxu1 %v3379_v16  ;;  %v2875_v15 = vld [vmem:[#allocation6 + $0x140] sm:$0xff]  ;;  %v2877_v16 = vld [vmem:[#allocation6 + $0x150] sm:$0xff] }
 0x23f   :  { %882 = vmatpush1.msra.mxu0 %v3380_v17  ;;  %953 = vmatpush1.msra.mxu1 %v3381_v18  ;;  %v2881_v17 = vld [vmem:[#allocation6 + $0x128] sm:$0xff]  ;;  %v2883_v18 = vld [vmem:[#allocation6 + $0x138] sm:$0xff] }
 0x240   :  { %883 = vmatprep.subr.mxu0 %v3382_v19  ;;  %954 = vmatprep.subr.mxu1 %v3383_v20  ;;  %v2887_v19 = vld [vmem:[#allocation6 + $0x120] sm:$0xff]  ;;  %v2889_v20 = vld [vmem:[#allocation6 + $0x130] sm:$0xff] }
 0x241   :  { %884 = vmatpush1.msra.mxu0 %v3384_v21  ;;  %917 = vmatprep.mubr.f32.mxu0 %v3385_v22  ;;  %v2893_v21 = vld [vmem:[#allocation6 + $0x108] sm:$0xff] }
 0x242   :  { %955 = vmatpush1.msra.mxu1 %v3386_v23  ;;  %988 = vmatprep.mubr.f32.mxu1 %v3385_v22  ;;  %v2895_v23 = vld [vmem:[#allocation6 + $0x118] sm:$0xff] }
 0x243   :  { %1101 = vmatprep.subr.mxu0 %v2809_v59  ;;  %1172 = vmatprep.subr.mxu1 %v2811_v52 }
 0x2e2   :  { %v671_v25 = vpop.f32.mrf.mxu0  ;;  %v742_v26 = vpop.f32.mrf.mxu1 }
 0x2e3   :  { %v751_v27 = vrot.slane %v671_v25, 4  ;;  %v753_v37 = vrot.slane %v742_v26, 4  ;;  %v2901_v25 = vld [vmem:[#allocation6 + $0x110] sm:$0xff]  ;;  %v2903_v26 = vld [vmem:[#allocation6 + $0xe8] sm:$0xff] }
 0x2e4   :  { %v673_v29 = vpop.f32.mrf.mxu0  ;;  %v744_v30 = vpop.f32.mrf.mxu1 }
 0x2e5   :  { %v759_v31 = vadd.f32 %v751_v27, %v534_v24  ;;  %v752_v32 = vrot.slane %v673_v29, 4  ;;  %v754_v33 = vrot.slane %v744_v30, 4  ;;  %v761_v39 = vadd.f32 %v753_v37, %v536_v38  ;;  %v2897_v24 = vld [vmem:[#allocation6 + $0x100] sm:$0xff]  ;;  %v2905_v27 = vld [vmem:[#allocation6 + $0xf8] sm:$0xff]  ;;  %v2911_v29 = vld [vmem:[#allocation6 + $0xf0] sm:$0xff] }
 0x2e6   :  { %v2913_v30 = vld [vmem:[#allocation6 + $0xc8] sm:$0xff]  ;;  %v2933_v37 = vld [vmem:[#allocation6 + $0xb0] sm:$0xff] }
 0x2e7   :  { %2210 = vtanh.f32 %v759_v31  ;;  %v760_v35 = vadd.f32 %v752_v32, %v535_v28  ;;  %v762_v36 = vadd.f32 %v754_v33, %v537_v34  ;;  %v2909_v28 = vld [vmem:[#allocation6 + $0xe0] sm:$0xff]  ;;  %v2917_v31 = vld [vmem:[#allocation6 + $0xd8] sm:$0xff]  ;;  %v2921_v33 = vld [vmem:[#allocation6 + $0xd0] sm:$0xff] }
 0x2e8   :  { %v2919_v32 = vld [vmem:[#allocation6 + $0xc0] sm:$0xff]  ;;  %v2925_v34 = vld [vmem:[#allocation6 + $0xa8] sm:$0xff] }
 0x2e9   :  { %2212 = vtanh.f32 %v760_v35  ;;  %v2927_v35 = vld [vmem:[#allocation6 + $0xb8] sm:$0xff]  ;;  %v2937_v38 = vld [vmem:[#allocation6 + $0x88] sm:$0xff] }
 0x2ea   :  { %2214 = vtanh.f32 %v762_v36  ;;  %v2931_v36 = vld [vmem:[#allocation6 + $0xa0] sm:$0xff]  ;;  %3389 = vst [vmem:[#allocation15_spill] sm:$0xff] %v2937_v38 }
 0x2eb   :  { %2216 = vtanh.f32 %v761_v39  ;;  %v2939_v39 = vld [vmem:[#allocation6 + $0x98] sm:$0xff] }
 0x2ec   :  { %3390 = vst [vmem:[#allocation17_spill] sm:$0xff] %v2939_v39 }
 0x2f4   :  { %v2211_v40 = vpop.eup %2210 }
 0x2f5   :  { %v767_v41 = vmul.f32 0.5, %v2211_v40  ;;  %v2943_v40 = vld [vmem:[#allocation6 + $0x80] sm:$0xff] }
 0x2f6   :  { %v2213_v42 = vpop.eup %2212  ;;  %3391 = vst [vmem:[#allocation16_spill] sm:$0xff] %v2943_v40 }
 0x2f7   :  { %v770_v43 = vadd.f32 0.5, %v767_v41  ;;  %v768_v44 = vmul.f32 0.5, %v2213_v42  ;;  %v2215_v49 = vpop.eup %2214  ;;  %v2945_v41 = vld [vmem:[#allocation6 + $0x90] sm:$0xff]  ;;  %v2949_v42 = vld [vmem:[#allocation6 + $0x68] sm:$0xff] }
 0x2f8   :  { %v2217_v55 = vpop.eup %2216  ;;  %3392 = vst [vmem:[#allocation19_spill] sm:$0xff] %v2945_v41  ;;  %3393 = vst [vmem:[#allocation18_spill] sm:$0xff] %v2949_v42 }
 0x2f9   :  { %v771_v45 = vadd.f32 0.5, %v768_v44  ;;  %v777_v1 = vmul.f32 %v2215_v49, %v770_v43  ;;  %v769_v61 = vmul.f32 0.5, %v2217_v55  ;;  %v2951_v43 = vld [vmem:[#allocation6 + $0x78] sm:$0xff]  ;;  %v2955_v44 = vld [vmem:[#allocation6 + $0x60] sm:$0xff]  ;;  %v2973_v55 = vld [vmem:[#allocation6 + $0x28] sm:$0xff] }
 0x2fa   :  { %3394 = vst [vmem:[#allocation21_spill] sm:$0xff] %v2951_v43  ;;  %3395 = vst [vmem:[#allocation20_spill] sm:$0xff] %v2955_v44  ;;  %v2963_v49 = vld [vmem:[#allocation6 + $0x58] sm:$0xff] }
 0x2fb   :  { %v776_v0 = vmul.f32 %v774_v46, %v771_v45  ;;  %v772_v57 = vadd.f32 0.5, %v769_v61  ;;  %v2957_v45 = vld [vmem:[#allocation6 + $0x70] sm:$0xff]  ;;  %v2961_v46 = vld [vmem:[#allocation6 + $0x48] sm:$0xff]  ;;  %3398 = vst [vmem:[#allocation25_spill] sm:$0xff] %v2963_v49  ;;  %3401 = vst [vmem:[#allocation26_spill] sm:$0xff] %v2973_v55 }
 0x2fc   :  { %3396 = vst [vmem:[#allocation23_spill] sm:$0xff] %v2957_v45  ;;  %3397 = vst [vmem:[#allocation22_spill] sm:$0xff] %v2961_v46  ;;  %v2975_v61 = vld [vmem:[#allocation6 + $0x38] sm:$0xff] }
 0x2fd   :  { %v2804_v4 = vadd.f32 %v777_v1, %v776_v0  ;;  %v2967_v0 = vld [vmem:[#allocation6 + $0x40] sm:$0xff]  ;;  %v2969_v1 = vld [vmem:[#allocation6 + $0x50] sm:$0xff]  ;;  %3402 = vst [vmem:[#allocation29_spill] sm:$0xff] %v2975_v61 }
 0x2fe   :  { %3399 = vst [vmem:[#allocation24_spill] sm:$0xff] %v2967_v0  ;;  %3400 = vst [vmem:[#allocation27_spill] sm:$0xff] %v2969_v1 }
 0x2ff   :  { %2218 = vtanh.f32 %v2804_v4 }
 0x30c   :  { %v2219_v62 = vpop.eup %2218 }
 0x30d   :  { %v780_v58 = vmul.f32 %v2219_v62, %v772_v57  ;;  %v2979_v57 = vld [vmem:[#allocation6 + $0x20] sm:$0xff]  ;;  %v2981_v62 = vld [vmem:[#allocation6 + $0x30] sm:$0xff] }
 0x30e   :  { %3403 = vst [vmem:[#allocation28_spill] sm:$0xff] %v2979_v57  ;;  %3404 = vst [vmem:[#allocation31_spill] sm:$0xff] %v2981_v62 }
 0x30f   :  { %781 = vst [vmem:[#allocation2] sm:$0x30] %v780_v58  ;;  %v851_v63 = vrot.slane %v780_v58, 4  ;;  %v2985_v58 = vld [vmem:[#allocation6 + $0x8] sm:$0xff] }
 0x310   :  { %3405 = vst [vmem:[#allocation30_spill] sm:$0xff] %v2985_v58 }
 0x311   :  { %918 = vmatmul.mubr.f32.vlgmr.msra.gmra.mxu0 %v851_v63  ;;  %989 = vmatmul.mubr.f32.vlgmr.msra.gmra.mxu1 %v851_v63  ;;  %v2987_v63 = vld [vmem:[#allocation6 + $0x18] sm:$0xff] }
 0x312   :  { %1165 = vmatprep.mubr.f32.mxu0 %v3385_v22  ;;  %1236 = vmatprep.mubr.f32.mxu1 %v3385_v22  ;;  %3406 = vst [vmem:[#allocation33_spill] sm:$0xff] %v2987_v63  ;;  %v2991_v22 = vld [vmem:[#allocation6] sm:$0xff] }
 0x313   :  { %1102 = vmatpush1.msra.mxu0 %v2815_v47  ;;  %1173 = vmatpush1.msra.mxu1 %v2817_v54  ;;  %3407 = vst [vmem:[#allocation32_spill] sm:$0xff] %v2991_v22 }
 0x314   :  { %1103 = vmatprep.subr.mxu0 %v2821_v48  ;;  %1174 = vmatprep.subr.mxu1 %v2823_v50 }
 0x315   :  { %1104 = vmatpush1.msra.mxu0 %v2827_v51  ;;  %1175 = vmatpush1.msra.mxu1 %v2829_v53 }
 0x316   :  { %1105 = vmatprep.subr.mxu0 %v2833_v56  ;;  %1176 = vmatprep.subr.mxu1 %v2835_v60 }
 0x317   :  { %1106 = vmatpush1.msra.mxu0 %v2839_v2  ;;  %1177 = vmatpush1.msra.mxu1 %v2841_v3 }
 0x318   :  { %1107 = vmatprep.subr.mxu0 %v2845_v5  ;;  %1178 = vmatprep.subr.mxu1 %v2847_v6 }
 0x319   :  { %1108 = vmatpush1.msra.mxu0 %v2851_v7  ;;  %1179 = vmatpush1.msra.mxu1 %v2853_v8 }
 0x31a   :  { %1109 = vmatprep.subr.mxu0 %v2857_v9  ;;  %1180 = vmatprep.subr.mxu1 %v2859_v10 }
 0x31b   :  { %1110 = vmatpush1.msra.mxu0 %v2863_v11  ;;  %1181 = vmatpush1.msra.mxu1 %v2865_v12 }
 0x31c   :  { %1111 = vmatprep.subr.mxu0 %v2869_v13  ;;  %1182 = vmatprep.subr.mxu1 %v2871_v14 }
 0x31d   :  { %1112 = vmatpush1.msra.mxu0 %v2875_v15  ;;  %1183 = vmatpush1.msra.mxu1 %v2877_v16 }
 0x31e   :  { %1113 = vmatprep.subr.mxu0 %v2881_v17  ;;  %1184 = vmatprep.subr.mxu1 %v2883_v18 }
 0x31f   :  { %1114 = vmatpush1.msra.mxu0 %v2887_v19  ;;  %1185 = vmatpush1.msra.mxu1 %v2889_v20 }
 0x320   :  { %1115 = vmatprep.subr.mxu0 %v2893_v21  ;;  %1186 = vmatprep.subr.mxu1 %v2895_v23 }
 0x321   :  { %1116 = vmatpush1.msra.mxu0 %v2897_v24  ;;  %1187 = vmatpush1.msra.mxu1 %v2901_v25 }
 0x322   :  { %1117 = vmatprep.subr.mxu0 %v2903_v26  ;;  %1188 = vmatprep.subr.mxu1 %v2905_v27 }
 0x323   :  { %1118 = vmatpush1.msra.mxu0 %v2909_v28  ;;  %1189 = vmatpush1.msra.mxu1 %v2911_v29 }
 0x324   :  { %1119 = vmatprep.subr.mxu0 %v2913_v30  ;;  %1190 = vmatprep.subr.mxu1 %v2917_v31 }
 0x325   :  { %1120 = vmatpush1.msra.mxu0 %v2919_v32  ;;  %1191 = vmatpush1.msra.mxu1 %v2921_v33 }
 0x326   :  { %1121 = vmatprep.subr.mxu0 %v2925_v34  ;;  %1192 = vmatprep.subr.mxu1 %v2927_v35 }
 0x327   :  { %1122 = vmatpush1.msra.mxu0 %v2931_v36  ;;  %1193 = vmatpush1.msra.mxu1 %v2933_v37 }
 0x328   :  { %1123 = vmatprep.subr.mxu0 %v2937_v38  ;;  %1194 = vmatprep.subr.mxu1 %v2939_v39 }
 0x329   :  { %1124 = vmatpush1.msra.mxu0 %v2943_v40  ;;  %1195 = vmatpush1.msra.mxu1 %v2945_v41 }
 0x32a   :  { %1125 = vmatprep.subr.mxu0 %v2949_v42  ;;  %1196 = vmatprep.subr.mxu1 %v2951_v43  ;;  %v785_v43 = vld [vmem:[#allocation3 + $0x18] sm:$0xc0] }
 0x32b   :  { %1126 = vmatpush1.msra.mxu0 %v2955_v44  ;;  %1197 = vmatpush1.msra.mxu1 %v2957_v45 }
 0x32c   :  { %1127 = vmatprep.subr.mxu0 %v2961_v46  ;;  %1198 = vmatprep.subr.mxu1 %v2963_v49  ;;  %v2993_v46 = vld [vmem:[#allocation6 + $0x10] sm:$0xff]  ;;  %v783_v49 = vld [vmem:[#allocation3 + $0x8] sm:$0xc0] }
 0x32d   :  { %1128 = vmatpush1.msra.mxu0 %v2967_v0  ;;  %1199 = vmatpush1.msra.mxu1 %v2969_v1  ;;  %3408 = vst [vmem:[#allocation34_spill] sm:$0xff] %v2993_v46 }
 0x32e   :  { %1129 = vmatprep.subr.mxu0 %v2973_v55  ;;  %1200 = vmatprep.subr.mxu1 %v2975_v61  ;;  %v782_v61 = vld [vmem:[#allocation3] sm:$0xc0] }
 0x32f   :  { %1130 = vmatpush1.msra.mxu0 %v2979_v57  ;;  %1201 = vmatpush1.msra.mxu1 %v2981_v62 }
 0x330   :  { %1131 = vmatprep.subr.mxu0 %v2985_v58  ;;  %1202 = vmatprep.subr.mxu1 %v2987_v63 }
 0x331   :  { %1132 = vmatpush1.msra.mxu0 %v2991_v22  ;;  %1203 = vmatpush1.msra.mxu1 %v2993_v46 }
 0x332   :  { %1334 = vmatprep.subr.mxu0 %v2809_v59  ;;  %1405 = vmatprep.subr.mxu1 %v2811_v52  ;;  %v784_v59 = vld [vmem:[#allocation3 + $0x10] sm:$0xc0] }
 0x3d1   :  { %v919_v55 = vpop.f32.mrf.mxu0  ;;  %v990_v1 = vpop.f32.mrf.mxu1 }
 0x3d2   :  { %v999_v0 = vrot.slane %v919_v55, 2  ;;  %v1001_v46 = vrot.slane %v990_v1, 2  ;;  %v3416_v1 = vld [vmem:[#allocation23_spill] sm:$0xff] }
 0x3d3   :  { %v921_v57 = vpop.f32.mrf.mxu0  ;;  %v992_v45 = vpop.f32.mrf.mxu1 }
 0x3d4   :  { %v1007_v62 = vadd.f32 %v999_v0, %v782_v61  ;;  %v1000_v44 = vrot.slane %v921_v57, 2  ;;  %v1002_v58 = vrot.slane %v992_v45, 2  ;;  %v1009_v42 = vadd.f32 %v1001_v46, %v784_v59 }
 0x3d5   :  { %v1022_v0 = vrot.slane %v2804_v4, 6  ;;  %v3409_v4 = vld [vmem:[#allocation15_spill] sm:$0xff] }
 0x3d6   :  { %2220 = vtanh.f32 %v1007_v62  ;;  %v1008_v63 = vadd.f32 %v1000_v44, %v783_v49  ;;  %v1010_v22 = vadd.f32 %v1002_v58, %v785_v43  ;;  %v3415_v49 = vld [vmem:[#allocation20_spill] sm:$0xff]  ;;  %v3417_v58 = vld [vmem:[#allocation22_spill] sm:$0xff] }
 0x3d8   :  { %2222 = vtanh.f32 %v1008_v63  ;;  %v3418_v63 = vld [vmem:[#allocation25_spill] sm:$0xff] }
 0x3d9   :  { %2224 = vtanh.f32 %v1010_v22 }
 0x3da   :  { %2226 = vtanh.f32 %v1009_v42  ;;  %v3414_v42 = vld [vmem:[#allocation21_spill] sm:$0xff] }
 0x3e3   :  { %v2221_v52 = vpop.eup %2220 }
 0x3e4   :  { %v1015_v41 = vmul.f32 0.5, %v2221_v52 }
 0x3e5   :  { %v2223_v40 = vpop.eup %2222 }
 0x3e6   :  { %v1018_v39 = vadd.f32 0.5, %v1015_v41  ;;  %v1016_v55 = vmul.f32 0.5, %v2223_v40  ;;  %v2225_v61 = vpop.eup %2224  ;;  %v3412_v40 = vld [vmem:[#allocation19_spill] sm:$0xff]  ;;  %v3413_v41 = vld [vmem:[#allocation18_spill] sm:$0xff] }
 0x3e7   :  { %v2227_v22 = vpop.eup %2226 }
 0x3e8   :  { %v1019_v38 = vadd.f32 0.5, %v1016_v55  ;;  %v1025_v57 = vmul.f32 %v2225_v61, %v1018_v39  ;;  %v1017_v43 = vmul.f32 0.5, %v2227_v22  ;;  %v3411_v39 = vld [vmem:[#allocation16_spill] sm:$0xff]  ;;  %v3421_v61 = vld [vmem:[#allocation26_spill] sm:$0xff]  ;;  %v3424_v22 = vld [vmem:[#allocation31_spill] sm:$0xff] }
 0x3e9   :  { %v3419_v55 = vld [vmem:[#allocation24_spill] sm:$0xff] }
 0x3ea   :  { %v1024_v45 = vmul.f32 %v1022_v0, %v1019_v38  ;;  %v1020_v44 = vadd.f32 0.5, %v1017_v43  ;;  %v3410_v38 = vld [vmem:[#allocation17_spill] sm:$0xff]  ;;  %v3420_v0 = vld [vmem:[#allocation27_spill] sm:$0xff]  ;;  %v3425_v43 = vld [vmem:[#allocation30_spill] sm:$0xff] }
 0x3ec   :  { %v3004_v62 = vadd.f32 %v1025_v57, %v1024_v45  ;;  %v3422_v45 = vld [vmem:[#allocation29_spill] sm:$0xff]  ;;  %v3423_v57 = vld [vmem:[#allocation28_spill] sm:$0xff] }
 0x3ee   :  { %2228 = vtanh.f32 %v3004_v62 }
 0x3fb   :  { %v2229_v59 = vpop.eup %2228 }
 0x3fc   :  { %v1028_v46 = vmul.f32 %v2229_v59, %v1020_v44  ;;  %v3426_v44 = vld [vmem:[#allocation33_spill] sm:$0xff]  ;;  %v3427_v59 = vld [vmem:[#allocation32_spill] sm:$0xff] }
 0x3fe   :  { %1029 = vst [vmem:[#allocation2] sm:$0xc0] %v1028_v46  ;;  %v1099_v52 = vrot.slane %v1028_v46, 6  ;;  %v3428_v46 = vmov 0.0  }
 0x400   :  { %1166 = vmatmul.mubr.f32.vlgmr.msra.gmra.mxu0 %v1099_v52  ;;  %1237 = vmatmul.mubr.f32.vlgmr.msra.gmra.mxu1 %v1099_v52  ;;  %v3429_v52 = vld [vmem:[#allocation34_spill] sm:$0xff] }
 0x401   :  { %1335 = vmatpush1.msra.mxu0 %v2815_v47  ;;  %1406 = vmatpush1.msra.mxu1 %v2817_v54 }
 0x402   :  { %1336 = vmatprep.subr.mxu0 %v2821_v48  ;;  %1407 = vmatprep.subr.mxu1 %v2823_v50 }
 0x403   :  { %1337 = vmatpush1.msra.mxu0 %v2827_v51  ;;  %1408 = vmatpush1.msra.mxu1 %v2829_v53 }
 0x404   :  { %1338 = vmatprep.subr.mxu0 %v2833_v56  ;;  %1409 = vmatprep.subr.mxu1 %v2835_v60 }
 0x405   :  { %1339 = vmatpush1.msra.mxu0 %v2839_v2  ;;  %1410 = vmatpush1.msra.mxu1 %v2841_v3 }
 0x406   :  { %1340 = vmatprep.subr.mxu0 %v2845_v5  ;;  %1411 = vmatprep.subr.mxu1 %v2847_v6 }
 0x407   :  { %1341 = vmatpush1.msra.mxu0 %v2851_v7  ;;  %1412 = vmatpush1.msra.mxu1 %v2853_v8 }
 0x408   :  { %1342 = vmatprep.subr.mxu0 %v2857_v9  ;;  %1413 = vmatprep.subr.mxu1 %v2859_v10 }
 0x409   :  { %1343 = vmatpush1.msra.mxu0 %v2863_v11  ;;  %1414 = vmatpush1.msra.mxu1 %v2865_v12 }
 0x40a   :  { %1344 = vmatprep.subr.mxu0 %v2869_v13  ;;  %1415 = vmatprep.subr.mxu1 %v2871_v14 }
 0x40b   :  { %1345 = vmatpush1.msra.mxu0 %v2875_v15  ;;  %1416 = vmatpush1.msra.mxu1 %v2877_v16 }
 0x40c   :  { %1346 = vmatprep.subr.mxu0 %v2881_v17  ;;  %1417 = vmatprep.subr.mxu1 %v2883_v18 }
 0x40d   :  { %1347 = vmatpush1.msra.mxu0 %v2887_v19  ;;  %1418 = vmatpush1.msra.mxu1 %v2889_v20 }
 0x40e   :  { %1348 = vmatprep.subr.mxu0 %v2893_v21  ;;  %1419 = vmatprep.subr.mxu1 %v2895_v23 }
 0x40f   :  { %1349 = vmatpush1.msra.mxu0 %v2897_v24  ;;  %1420 = vmatpush1.msra.mxu1 %v2901_v25 }
 0x410   :  { %1350 = vmatprep.subr.mxu0 %v2903_v26  ;;  %1421 = vmatprep.subr.mxu1 %v2905_v27 }
 0x411   :  { %1351 = vmatpush1.msra.mxu0 %v2909_v28  ;;  %1422 = vmatpush1.msra.mxu1 %v2911_v29 }
 0x412   :  { %1352 = vmatprep.subr.mxu0 %v2913_v30  ;;  %1423 = vmatprep.subr.mxu1 %v2917_v31 }
 0x413   :  { %1353 = vmatpush1.msra.mxu0 %v2919_v32  ;;  %1424 = vmatpush1.msra.mxu1 %v2921_v33 }
 0x414   :  { %1354 = vmatprep.subr.mxu0 %v2925_v34  ;;  %1425 = vmatprep.subr.mxu1 %v2927_v35 }
 0x415   :  { %1355 = vmatpush1.msra.mxu0 %v2931_v36  ;;  %1426 = vmatpush1.msra.mxu1 %v2933_v37 }
 0x416   :  { %1356 = vmatprep.subr.mxu0 %v3409_v4  ;;  %1427 = vmatprep.subr.mxu1 %v3410_v38 }
 0x417   :  { %1357 = vmatpush1.msra.mxu0 %v3411_v39  ;;  %1428 = vmatpush1.msra.mxu1 %v3412_v40  ;;  %v1258_v39 = vrot.slane %v3004_v62, 6  ;;  %v3432_v62 = vld [vmem:[#allocation15_spill] sm:$0xff] }
 0x418   :  { %1358 = vmatprep.subr.mxu0 %v3413_v41  ;;  %1429 = vmatprep.subr.mxu1 %v3414_v42 }
 0x419   :  { %1359 = vmatpush1.msra.mxu0 %v3415_v49  ;;  %1430 = vmatpush1.msra.mxu1 %v3416_v1 }
 0x41a   :  { %1360 = vmatprep.subr.mxu0 %v3417_v58  ;;  %1431 = vmatprep.subr.mxu1 %v3418_v63  ;;  %v1033_v58 = vld [vmem:[#allocation3 + $0x38] sm:$0x3] }
 0x41b   :  { %1361 = vmatpush1.msra.mxu0 %v3419_v55  ;;  %1432 = vmatpush1.msra.mxu1 %v3420_v0  ;;  %v3430_v0 = vld [vmem:[#allocation13_spill] sm:$0xff] }
 0x41c   :  { %1362 = vmatprep.subr.mxu0 %v3421_v61  ;;  %1433 = vmatprep.subr.mxu1 %v3422_v45  ;;  %v3431_v61 = vld [vmem:[#allocation14_spill] sm:$0xff]  ;;  %v1030_v45 = vld [vmem:[#allocation3 + $0x20] sm:$0x3] }
 0x41d   :  { %1363 = vmatpush1.msra.mxu0 %v3423_v57  ;;  %1434 = vmatpush1.msra.mxu1 %v3424_v22  ;;  %v1031_v22 = vld [vmem:[#allocation3 + $0x28] sm:$0x3] }
 0x41e   :  { %1364 = vmatprep.subr.mxu0 %v3425_v43  ;;  %1435 = vmatprep.subr.mxu1 %v3426_v44 }
 0x41f   :  { %1365 = vmatpush1.msra.mxu0 %v3427_v59  ;;  %1398 = vmatprep.mubr.f32.mxu0 %v3428_v46 }
 0x420   :  { %1436 = vmatpush1.msra.mxu1 %v3429_v52  ;;  %1469 = vmatprep.mubr.f32.mxu1 %v3428_v46  ;;  %v1032_v52 = vld [vmem:[#allocation3 + $0x30] sm:$0x3] }
 0x421   :  { %1582 = vmatprep.subr.mxu0 %v3430_v0  ;;  %1653 = vmatprep.subr.mxu1 %v3431_v61 }
 0x4c0   :  { %v1167_v57 = vpop.f32.mrf.mxu0  ;;  %v1238_v55 = vpop.f32.mrf.mxu1 }
 0x4c1   :  { %v1243_v63 = vadd.f32 %v1167_v57, %v1030_v45  ;;  %v1245_v49 = vadd.f32 %v1238_v55, %v1032_v52  ;;  %v3445_v52 = vld [vmem:[#allocation29_spill] sm:$0xff] }
 0x4c2   :  { %v1169_v43 = vpop.f32.mrf.mxu0  ;;  %v1240_v44 = vpop.f32.mrf.mxu1 }
 0x4c3   :  { %2230 = vtanh.f32 %v1243_v63  ;;  %v1244_v59 = vadd.f32 %v1169_v43, %v1031_v22  ;;  %v1246_v1 = vadd.f32 %v1240_v44, %v1033_v58  ;;  %v3441_v43 = vld [vmem:[#allocation25_spill] sm:$0xff]  ;;  %v3442_v44 = vld [vmem:[#allocation24_spill] sm:$0xff] }
 0x4c5   :  { %2232 = vtanh.f32 %v1244_v59  ;;  %v3443_v59 = vld [vmem:[#allocation27_spill] sm:$0xff] }
 0x4c6   :  { %2234 = vtanh.f32 %v1246_v1 }
 0x4c7   :  { %2236 = vtanh.f32 %v1245_v49  ;;  %v3438_v49 = vld [vmem:[#allocation20_spill] sm:$0xff] }
 0x4d0   :  { %v2231_v46 = vpop.eup %2230 }
 0x4d1   :  { %v1251_v42 = vmul.f32 0.5, %v2231_v46  ;;  %v3444_v46 = vld [vmem:[#allocation26_spill] sm:$0xff] }
 0x4d2   :  { %v2233_v0 = vpop.eup %2232 }
 0x4d3   :  { %v1254_v41 = vadd.f32 0.5, %v1251_v42  ;;  %v1252_v61 = vmul.f32 0.5, %v2233_v0  ;;  %v2235_v45 = vpop.eup %2234  ;;  %v3437_v42 = vld [vmem:[#allocation21_spill] sm:$0xff]  ;;  %v3439_v0 = vld [vmem:[#allocation23_spill] sm:$0xff] }
 0x4d4   :  { %v2237_v58 = vpop.eup %2236 }
 0x4d5   :  { %v1255_v40 = vadd.f32 0.5, %v1252_v61  ;;  %v1261_v38 = vmul.f32 %v2235_v45, %v1254_v41  ;;  %v1253_v1 = vmul.f32 0.5, %v2237_v58  ;;  %v3436_v41 = vld [vmem:[#allocation18_spill] sm:$0xff]  ;;  %v3446_v45 = vld [vmem:[#allocation28_spill] sm:$0xff] }
 0x4d6   :  { %v3440_v61 = vld [vmem:[#allocation22_spill] sm:$0xff] }
 0x4d7   :  { %v1260_v57 = vmul.f32 %v1258_v39, %v1255_v40  ;;  %v1256_v63 = vadd.f32 0.5, %v1253_v1  ;;  %v3434_v39 = vld [vmem:[#allocation16_spill] sm:$0xff]  ;;  %v3435_v40 = vld [vmem:[#allocation19_spill] sm:$0xff]  ;;  %v3448_v58 = vld [vmem:[#allocation30_spill] sm:$0xff] }
 0x4d8   :  { %v3449_v1 = vld [vmem:[#allocation33_spill] sm:$0xff] }
 0x4d9   :  { %v3074_v4 = vadd.f32 %v1261_v38, %v1260_v57  ;;  %v3433_v38 = vld [vmem:[#allocation17_spill] sm:$0xff]  ;;  %v3447_v57 = vld [vmem:[#allocation31_spill] sm:$0xff] }
 0x4db   :  { %2238 = vtanh.f32 %v3074_v4 }
 0x4e8   :  { %v2239_v55 = vpop.eup %2238 }
 0x4e9   :  { %v1264_v22 = vmul.f32 %v2239_v55, %v1256_v63  ;;  %v3450_v63 = vld [vmem:[#allocation32_spill] sm:$0xff]  ;;  %v3451_v55 = vmov 0.0  }
 0x4eb   :  { %1265 = vst [vmem:[#allocation2 + $0x8] sm:$0x3] %v1264_v22  ;;  %1399 = vmatmul.mubr.f32.vlgmr.msra.gmra.mxu0 %v1264_v22  ;;  %1470 = vmatmul.mubr.f32.vlgmr.msra.gmra.mxu1 %v1264_v22  ;;  %v3452_v22 = vld [vmem:[#allocation34_spill] sm:$0xff] }
 0x4ec   :  { %1583 = vmatpush1.msra.mxu0 %v2815_v47  ;;  %1654 = vmatpush1.msra.mxu1 %v2817_v54 }
 0x4ed   :  { %1584 = vmatprep.subr.mxu0 %v2821_v48  ;;  %1655 = vmatprep.subr.mxu1 %v2823_v50 }
 0x4ee   :  { %1585 = vmatpush1.msra.mxu0 %v2827_v51  ;;  %1656 = vmatpush1.msra.mxu1 %v2829_v53 }
 0x4ef   :  { %1586 = vmatprep.subr.mxu0 %v2833_v56  ;;  %1657 = vmatprep.subr.mxu1 %v2835_v60 }
 0x4f0   :  { %1587 = vmatpush1.msra.mxu0 %v2839_v2  ;;  %1658 = vmatpush1.msra.mxu1 %v2841_v3 }
 0x4f1   :  { %1588 = vmatprep.subr.mxu0 %v2845_v5  ;;  %1659 = vmatprep.subr.mxu1 %v2847_v6 }
 0x4f2   :  { %1589 = vmatpush1.msra.mxu0 %v2851_v7  ;;  %1660 = vmatpush1.msra.mxu1 %v2853_v8 }
 0x4f3   :  { %1590 = vmatprep.subr.mxu0 %v2857_v9  ;;  %1661 = vmatprep.subr.mxu1 %v2859_v10 }
 0x4f4   :  { %1591 = vmatpush1.msra.mxu0 %v2863_v11  ;;  %1662 = vmatpush1.msra.mxu1 %v2865_v12 }
 0x4f5   :  { %1592 = vmatprep.subr.mxu0 %v2869_v13  ;;  %1663 = vmatprep.subr.mxu1 %v2871_v14 }
 0x4f6   :  { %1593 = vmatpush1.msra.mxu0 %v2875_v15  ;;  %1664 = vmatpush1.msra.mxu1 %v2877_v16 }
 0x4f7   :  { %1594 = vmatprep.subr.mxu0 %v2881_v17  ;;  %1665 = vmatprep.subr.mxu1 %v2883_v18 }
 0x4f8   :  { %1595 = vmatpush1.msra.mxu0 %v2887_v19  ;;  %1666 = vmatpush1.msra.mxu1 %v2889_v20 }
 0x4f9   :  { %1596 = vmatprep.subr.mxu0 %v2893_v21  ;;  %1667 = vmatprep.subr.mxu1 %v2895_v23 }
 0x4fa   :  { %1597 = vmatpush1.msra.mxu0 %v2897_v24  ;;  %1668 = vmatpush1.msra.mxu1 %v2901_v25 }
 0x4fb   :  { %1598 = vmatprep.subr.mxu0 %v2903_v26  ;;  %1669 = vmatprep.subr.mxu1 %v2905_v27 }
 0x4fc   :  { %1599 = vmatpush1.msra.mxu0 %v2909_v28  ;;  %1670 = vmatpush1.msra.mxu1 %v2911_v29 }
 0x4fd   :  { %1600 = vmatprep.subr.mxu0 %v2913_v30  ;;  %1671 = vmatprep.subr.mxu1 %v2917_v31 }
 0x4fe   :  { %1601 = vmatpush1.msra.mxu0 %v2919_v32  ;;  %1672 = vmatpush1.msra.mxu1 %v2921_v33 }
 0x4ff   :  { %1602 = vmatprep.subr.mxu0 %v2925_v34  ;;  %1673 = vmatprep.subr.mxu1 %v2927_v35 }
 0x500   :  { %1603 = vmatpush1.msra.mxu0 %v2931_v36  ;;  %1674 = vmatpush1.msra.mxu1 %v2933_v37 }
 0x501   :  { %1604 = vmatprep.subr.mxu0 %v3432_v62  ;;  %1675 = vmatprep.subr.mxu1 %v3433_v38 }
 0x502   :  { %1605 = vmatpush1.msra.mxu0 %v3434_v39  ;;  %1676 = vmatpush1.msra.mxu1 %v3435_v40 }
 0x503   :  { %1606 = vmatprep.subr.mxu0 %v3436_v41  ;;  %1677 = vmatprep.subr.mxu1 %v3437_v42 }
 0x504   :  { %1607 = vmatpush1.msra.mxu0 %v3438_v49  ;;  %1678 = vmatpush1.msra.mxu1 %v3439_v0  ;;  %v1269_v49 = vld [vmem:[#allocation3 + $0x38] sm:$0xc] }
 0x505   :  { %1608 = vmatprep.subr.mxu0 %v3440_v61  ;;  %1679 = vmatprep.subr.mxu1 %v3441_v43  ;;  %v1267_v43 = vld [vmem:[#allocation3 + $0x28] sm:$0xc] }
 0x506   :  { %1609 = vmatpush1.msra.mxu0 %v3442_v44  ;;  %1680 = vmatpush1.msra.mxu1 %v3443_v59  ;;  %v3453_v59 = vld [vmem:[#allocation13_spill] sm:$0xff] }
 0x507   :  { %1610 = vmatprep.subr.mxu0 %v3444_v46  ;;  %1681 = vmatprep.subr.mxu1 %v3445_v52  ;;  %v3454_v46 = vld [vmem:[#allocation14_spill] sm:$0xff]  ;;  %v1266_v52 = vld [vmem:[#allocation3 + $0x20] sm:$0xc] }
 0x508   :  { %1611 = vmatpush1.msra.mxu0 %v3446_v45  ;;  %1682 = vmatpush1.msra.mxu1 %v3447_v57 }
 0x509   :  { %1612 = vmatprep.subr.mxu0 %v3448_v58  ;;  %1683 = vmatprep.subr.mxu1 %v3449_v1 }
 0x50a   :  { %1613 = vmatpush1.msra.mxu0 %v3450_v63  ;;  %1646 = vmatprep.mubr.f32.mxu0 %v3451_v55 }
 0x50b   :  { %1684 = vmatpush1.msra.mxu1 %v3452_v22  ;;  %1717 = vmatprep.mubr.f32.mxu1 %v3451_v55 }
 0x50c   :  { %1830 = vmatprep.subr.mxu0 %v3453_v59  ;;  %1901 = vmatprep.subr.mxu1 %v3454_v46  ;;  %v1268_v59 = vld [vmem:[#allocation3 + $0x30] sm:$0xc] }
 0x5ab   :  { %v1400_v45 = vpop.f32.mrf.mxu0  ;;  %v1471_v44 = vpop.f32.mrf.mxu1 }
 0x5ac   :  { %v1480_v57 = vrot.slane %v1400_v45, 6  ;;  %v1482_v55 = vrot.slane %v1471_v44, 6 }
 0x5ad   :  { %v1402_v58 = vpop.f32.mrf.mxu0  ;;  %v1473_v61 = vpop.f32.mrf.mxu1 }
 0x5ae   :  { %v1488_v1 = vadd.f32 %v1480_v57, %v1266_v52  ;;  %v1481_v0 = vrot.slane %v1402_v58, 6  ;;  %v1483_v63 = vrot.slane %v1473_v61, 6  ;;  %v1490_v41 = vadd.f32 %v1482_v55, %v1268_v59 }
 0x5af   :  { %v1503_v52 = vrot.slane %v3074_v4, 6 }
 0x5b0   :  { %2240 = vtanh.f32 %v1488_v1  ;;  %v1489_v42 = vadd.f32 %v1481_v0, %v1267_v43  ;;  %v1491_v22 = vadd.f32 %v1483_v63, %v1269_v49 }
 0x5b2   :  { %2242 = vtanh.f32 %v1489_v42 }
 0x5b3   :  { %2244 = vtanh.f32 %v1491_v22 }
 0x5b4   :  { %2246 = vtanh.f32 %v1490_v41 }
 0x5bd   :  { %v2241_v46 = vpop.eup %2240 }
 0x5be   :  { %v1496_v40 = vmul.f32 0.5, %v2241_v46 }
 0x5bf   :  { %v2243_v39 = vpop.eup %2242 }
 0x5c0   :  { %v1499_v38 = vadd.f32 0.5, %v1496_v40  ;;  %v1497_v45 = vmul.f32 0.5, %v2243_v39  ;;  %v2245_v57 = vpop.eup %2244 }
 0x5c1   :  { %v2247_v42 = vpop.eup %2246 }
 0x5c2   :  { %v1500_v62 = vadd.f32 0.5, %v1497_v45  ;;  %v1506_v58 = vmul.f32 %v2245_v57, %v1499_v38  ;;  %v1498_v49 = vmul.f32 0.5, %v2247_v42  ;;  %v2007_v57 = vld [vmem:[#allocation2] sm:$0xff]  ;;  %v2021_v42 = vld [vmem:[#allocation8 + $0x60] sm:$0xff] }
 0x5c4   :  { %v1505_v61 = vmul.f32 %v1503_v52, %v1500_v62  ;;  %v1501_v0 = vadd.f32 0.5, %v1498_v49  ;;  %v2020_v49 = vld [vmem:[#allocation8 + $0x58] sm:$0xff] }
 0x5c6   :  { %v3144_v1 = vadd.f32 %v1506_v58, %v1505_v61  ;;  %v2024_v61 = vld [vmem:[#allocation8 + $0x78] sm:$0xff]  ;;  %v2023_v58 = vld [vmem:[#allocation8 + $0x70] sm:$0xff] }
 0x5c8   :  { %2248 = vtanh.f32 %v3144_v1  ;;  %v1751_v62 = vrot.slane %v3144_v1, 6  ;;  %v2022_v1 = vld [vmem:[#allocation8 + $0x68] sm:$0xff] }
 0x5d5   :  { %v2249_v43 = vpop.eup %2248 }
 0x5d6   :  { %v1509_v44 = vmul.f32 %v2249_v43, %v1501_v0  ;;  %v2019_v0 = vld [vmem:[#allocation8 + $0x50] sm:$0xff]  ;;  %v2018_v43 = vld [vmem:[#allocation8 + $0x48] sm:$0xff] }
 0x5d8   :  { %1510 = vst [vmem:[#allocation2 + $0x8] sm:$0xc] %v1509_v44  ;;  %v1580_v63 = vrot.slane %v1509_v44, 2  ;;  %v2017_v44 = vld [vmem:[#allocation8 + $0x40] sm:$0xff] }
 0x5da   :  { %1647 = vmatmul.mubr.f32.vlgmr.msra.gmra.mxu0 %v1580_v63  ;;  %1718 = vmatmul.mubr.f32.vlgmr.msra.gmra.mxu1 %v1580_v63  ;;  %v2016_v63 = vld [vmem:[#allocation8 + $0x38] sm:$0xff] }
 0x5db   :  { %1831 = vmatpush1.msra.mxu0 %v2815_v47  ;;  %1902 = vmatpush1.msra.mxu1 %v2817_v54  ;;  %v3455_v47 = vld [vmem:[#allocation15_spill] sm:$0xff]  ;;  %v3456_v54 = vld [vmem:[#allocation17_spill] sm:$0xff] }
 0x5dc   :  { %1832 = vmatprep.subr.mxu0 %v2821_v48  ;;  %1903 = vmatprep.subr.mxu1 %v2823_v50  ;;  %v3457_v48 = vld [vmem:[#allocation16_spill] sm:$0xff]  ;;  %v3458_v50 = vld [vmem:[#allocation19_spill] sm:$0xff] }
 0x5dd   :  { %1833 = vmatpush1.msra.mxu0 %v2827_v51  ;;  %1904 = vmatpush1.msra.mxu1 %v2829_v53  ;;  %v3459_v51 = vld [vmem:[#allocation18_spill] sm:$0xff]  ;;  %v3460_v53 = vld [vmem:[#allocation21_spill] sm:$0xff] }
 0x5de   :  { %1834 = vmatprep.subr.mxu0 %v2833_v56  ;;  %1905 = vmatprep.subr.mxu1 %v2835_v60  ;;  %v3461_v56 = vld [vmem:[#allocation20_spill] sm:$0xff]  ;;  %v3462_v60 = vld [vmem:[#allocation23_spill] sm:$0xff] }
 0x5df   :  { %1835 = vmatpush1.msra.mxu0 %v2839_v2  ;;  %1906 = vmatpush1.msra.mxu1 %v2841_v3  ;;  %v3463_v2 = vld [vmem:[#allocation22_spill] sm:$0xff]  ;;  %v3464_v3 = vld [vmem:[#allocation25_spill] sm:$0xff] }
 0x5e0   :  { %1836 = vmatprep.subr.mxu0 %v2845_v5  ;;  %1907 = vmatprep.subr.mxu1 %v2847_v6  ;;  %v3465_v5 = vld [vmem:[#allocation24_spill] sm:$0xff]  ;;  %v3466_v6 = vld [vmem:[#allocation27_spill] sm:$0xff] }
 0x5e1   :  { %1837 = vmatpush1.msra.mxu0 %v2851_v7  ;;  %1908 = vmatpush1.msra.mxu1 %v2853_v8  ;;  %v3467_v7 = vld [vmem:[#allocation26_spill] sm:$0xff]  ;;  %v3468_v8 = vld [vmem:[#allocation29_spill] sm:$0xff] }
 0x5e2   :  { %1838 = vmatprep.subr.mxu0 %v2857_v9  ;;  %1909 = vmatprep.subr.mxu1 %v2859_v10  ;;  %v3469_v9 = vld [vmem:[#allocation28_spill] sm:$0xff]  ;;  %v3470_v10 = vld [vmem:[#allocation31_spill] sm:$0xff] }
 0x5e3   :  { %1839 = vmatpush1.msra.mxu0 %v2863_v11  ;;  %1910 = vmatpush1.msra.mxu1 %v2865_v12  ;;  %v3471_v11 = vld [vmem:[#allocation30_spill] sm:$0xff]  ;;  %v3472_v12 = vld [vmem:[#allocation33_spill] sm:$0xff] }
 0x5e4   :  { %1840 = vmatprep.subr.mxu0 %v2869_v13  ;;  %1911 = vmatprep.subr.mxu1 %v2871_v14  ;;  %v3473_v13 = vld [vmem:[#allocation32_spill] sm:$0xff]  ;;  %v3474_v14 = vmov 0.0  }
 0x5e5   :  { %1841 = vmatpush1.msra.mxu0 %v2875_v15  ;;  %1912 = vmatpush1.msra.mxu1 %v2877_v16  ;;  %v3475_v15 = vld [vmem:[#allocation34_spill] sm:$0xff]  ;;  %v1511_v16 = vld [vmem:[#allocation3 + $0x20] sm:$0x30] }
 0x5e6   :  { %1842 = vmatprep.subr.mxu0 %v2881_v17  ;;  %1913 = vmatprep.subr.mxu1 %v2883_v18 }
 0x5e7   :  { %1843 = vmatpush1.msra.mxu0 %v2887_v19  ;;  %1914 = vmatpush1.msra.mxu1 %v2889_v20  ;;  %v1512_v20 = vld [vmem:[#allocation3 + $0x28] sm:$0x30] }
 0x5e8   :  { %1844 = vmatprep.subr.mxu0 %v2893_v21  ;;  %1915 = vmatprep.subr.mxu1 %v2895_v23 }
 0x5e9   :  { %1845 = vmatpush1.msra.mxu0 %v2897_v24  ;;  %1916 = vmatpush1.msra.mxu1 %v2901_v25 }
 0x5ea   :  { %1846 = vmatprep.subr.mxu0 %v2903_v26  ;;  %1917 = vmatprep.subr.mxu1 %v2905_v27  ;;  %v1514_v27 = vld [vmem:[#allocation3 + $0x38] sm:$0x30] }
 0x5eb   :  { %1847 = vmatpush1.msra.mxu0 %v2909_v28  ;;  %1918 = vmatpush1.msra.mxu1 %v2911_v29 }
 0x5ec   :  { %1848 = vmatprep.subr.mxu0 %v2913_v30  ;;  %1919 = vmatprep.subr.mxu1 %v2917_v31  ;;  %v1513_v31 = vld [vmem:[#allocation3 + $0x30] sm:$0x30] }
 0x5ed   :  { %1849 = vmatpush1.msra.mxu0 %v2919_v32  ;;  %1920 = vmatpush1.msra.mxu1 %v2921_v33 }
 0x5ee   :  { %1850 = vmatprep.subr.mxu0 %v2925_v34  ;;  %1921 = vmatprep.subr.mxu1 %v2927_v35 }
 0x5ef   :  { %1851 = vmatpush1.msra.mxu0 %v2931_v36  ;;  %1922 = vmatpush1.msra.mxu1 %v2933_v37 }
 0x5f0   :  { %1852 = vmatprep.subr.mxu0 %v3455_v47  ;;  %1923 = vmatprep.subr.mxu1 %v3456_v54  ;;  %v2015_v47 = vld [vmem:[#allocation8 + $0x30] sm:$0xff]  ;;  %v2014_v54 = vld [vmem:[#allocation8 + $0x28] sm:$0xff] }
 0x5f1   :  { %1853 = vmatpush1.msra.mxu0 %v3457_v48  ;;  %1924 = vmatpush1.msra.mxu1 %v3458_v50  ;;  %v2013_v48 = vld [vmem:[#allocation8 + $0x20] sm:$0xff]  ;;  %v2012_v50 = vld [vmem:[#allocation8 + $0x18] sm:$0xff] }
 0x5f2   :  { %1854 = vmatprep.subr.mxu0 %v3459_v51  ;;  %1925 = vmatprep.subr.mxu1 %v3460_v53  ;;  %v2011_v51 = vld [vmem:[#allocation8 + $0x10] sm:$0xff]  ;;  %v2010_v53 = vld [vmem:[#allocation8 + $0x8] sm:$0xff] }
 0x5f3   :  { %1855 = vmatpush1.msra.mxu0 %v3461_v56  ;;  %1926 = vmatpush1.msra.mxu1 %v3462_v60  ;;  %v2009_v56 = vld [vmem:[#allocation8] sm:$0xff] }
 0x5f4   :  { %1856 = vmatprep.subr.mxu0 %v3463_v2  ;;  %1927 = vmatprep.subr.mxu1 %v3464_v3  ;;  %v1759_v60 = vld [vmem:[#allocation3 + $0x20] sm:$0xc0] }
 0x5f5   :  { %1857 = vmatpush1.msra.mxu0 %v3465_v5  ;;  %1928 = vmatpush1.msra.mxu1 %v3466_v6  ;;  %v1760_v6 = vld [vmem:[#allocation3 + $0x28] sm:$0xc0] }
 0x5f6   :  { %1858 = vmatprep.subr.mxu0 %v3467_v7  ;;  %1929 = vmatprep.subr.mxu1 %v3468_v8 }
 0x5f7   :  { %1859 = vmatpush1.msra.mxu0 %v3469_v9  ;;  %1930 = vmatpush1.msra.mxu1 %v3470_v10 }
 0x5f8   :  { %1860 = vmatprep.subr.mxu0 %v3471_v11  ;;  %1931 = vmatprep.subr.mxu1 %v3472_v12  ;;  %v1762_v12 = vld [vmem:[#allocation3 + $0x38] sm:$0xc0] }
 0x5f9   :  { %1861 = vmatpush1.msra.mxu0 %v3473_v13  ;;  %1894 = vmatprep.mubr.f32.mxu0 %v3474_v14 }
 0x5fa   :  { %1932 = vmatpush1.msra.mxu1 %v3475_v15  ;;  %1965 = vmatprep.mubr.f32.mxu1 %v3474_v14 }
 0x5fb   :  { %2146 = vmatprep.subr.mxu0 %v2024_v61 }
 0x69a   :  { %v1648_v17 = vpop.f32.mrf.mxu0  ;;  %v1719_v18 = vpop.f32.mrf.mxu1 }
 0x69b   :  { %v1728_v19 = vrot.slane %v1648_v17, 4  ;;  %v1730_v30 = vrot.slane %v1719_v18, 4 }
 0x69c   :  { %v1650_v21 = vpop.f32.mrf.mxu0  ;;  %v1721_v23 = vpop.f32.mrf.mxu1 }
 0x69d   :  { %v1736_v24 = vadd.f32 %v1728_v19, %v1511_v16  ;;  %v1729_v25 = vrot.slane %v1650_v21, 4  ;;  %v1731_v26 = vrot.slane %v1721_v23, 4  ;;  %v1738_v32 = vadd.f32 %v1730_v30, %v1513_v31  ;;  %v1761_v16 = vld [vmem:[#allocation3 + $0x30] sm:$0xc0] }
 0x69f   :  { %2250 = vtanh.f32 %v1736_v24  ;;  %v1737_v28 = vadd.f32 %v1729_v25, %v1512_v20  ;;  %v1739_v29 = vadd.f32 %v1731_v26, %v1514_v27 }
 0x6a1   :  { %2252 = vtanh.f32 %v1737_v28 }
 0x6a2   :  { %2254 = vtanh.f32 %v1739_v29 }
 0x6a3   :  { %2256 = vtanh.f32 %v1738_v32 }
 0x6ac   :  { %v2251_v33 = vpop.eup %2250 }
 0x6ad   :  { %v1744_v34 = vmul.f32 0.5, %v2251_v33 }
 0x6ae   :  { %v2253_v35 = vpop.eup %2252 }
 0x6af   :  { %v1747_v36 = vadd.f32 0.5, %v1744_v34  ;;  %v1745_v37 = vmul.f32 0.5, %v2253_v35  ;;  %v2255_v38 = vpop.eup %2254 }
 0x6b0   :  { %v2257_v55 = vpop.eup %2256 }
 0x6b1   :  { %v1748_v4 = vadd.f32 0.5, %v1745_v37  ;;  %v1754_v40 = vmul.f32 %v2255_v38, %v1747_v36  ;;  %v1746_v22 = vmul.f32 0.5, %v2257_v55  ;;  %v2127_v36 = vld [vmem:[%s3228_s3] ss:$0 sm:$0xff] }
 0x6b3   :  { %v1753_v39 = vmul.f32 %v1751_v62, %v1748_v4  ;;  %v1749_v59 = vadd.f32 0.5, %v1746_v22 }
 0x6b5   :  { %v3212_v41 = vadd.f32 %v1754_v40, %v1753_v39 }
 0x6b7   :  { %2258 = vtanh.f32 %v3212_v41  ;;  %v1999_v25 = vrot.slane %v3212_v41, 6 }
 0x6c4   :  { %v2259_v46 = vpop.eup %2258 }
 0x6c5   :  { %v1757_v45 = vmul.f32 %v2259_v46, %v1749_v59 }
 0x6c7   :  { %1758 = vst [vmem:[#allocation2 + $0x8] sm:$0x30] %v1757_v45  ;;  %v1828_v52 = vrot.slane %v1757_v45, 4 }
 0x6c9   :  { %1895 = vmatmul.mubr.f32.vlgmr.msra.gmra.mxu0 %v1828_v52  ;;  %1966 = vmatmul.mubr.f32.vlgmr.msra.gmra.mxu1 %v1828_v52 }
 0x6ca   :  { %2178 = vmatprep.mubr.f32.mxu0 %v2007_v57  ;;  %2147 = vmatpush3.msra.mxu0 %v2024_v61 }
 0x6cb   :  { %2148 = vmatprep.subr.mxu0 %v2023_v58 }
 0x6cc   :  { %2149 = vmatpush3.msra.mxu0 %v2023_v58 }
 0x6cd   :  { %2150 = vmatprep.subr.mxu0 %v2022_v1 }
 0x6ce   :  { %2151 = vmatpush3.msra.mxu0 %v2022_v1 }
 0x6cf   :  { %2152 = vmatprep.subr.mxu0 %v2021_v42 }
 0x6d0   :  { %2153 = vmatpush3.msra.mxu0 %v2021_v42 }
 0x6d1   :  { %2154 = vmatprep.subr.mxu0 %v2020_v49 }
 0x6d2   :  { %2155 = vmatpush3.msra.mxu0 %v2020_v49 }
 0x6d3   :  { %2156 = vmatprep.subr.mxu0 %v2019_v0 }
 0x6d4   :  { %2157 = vmatpush3.msra.mxu0 %v2019_v0 }
 0x6d5   :  { %2158 = vmatprep.subr.mxu0 %v2018_v43 }
 0x6d6   :  { %2159 = vmatpush3.msra.mxu0 %v2018_v43 }
 0x6d7   :  { %2160 = vmatprep.subr.mxu0 %v2017_v44 }
 0x6d8   :  { %2161 = vmatpush3.msra.mxu0 %v2017_v44 }
 0x6d9   :  { %2162 = vmatprep.subr.mxu0 %v2016_v63 }
 0x6da   :  { %2163 = vmatpush3.msra.mxu0 %v2016_v63 }
 0x6db   :  { %2164 = vmatprep.subr.mxu0 %v2015_v47 }
 0x6dc   :  { %2165 = vmatpush3.msra.mxu0 %v2015_v47 }
 0x6dd   :  { %2166 = vmatprep.subr.mxu0 %v2014_v54 }
 0x6de   :  { %2167 = vmatpush3.msra.mxu0 %v2014_v54 }
 0x6df   :  { %2168 = vmatprep.subr.mxu0 %v2013_v48 }
 0x6e0   :  { %2169 = vmatpush3.msra.mxu0 %v2013_v48 }
 0x6e1   :  { %2170 = vmatprep.subr.mxu0 %v2012_v50 }
 0x6e2   :  { %2171 = vmatpush3.msra.mxu0 %v2012_v50 }
 0x6e3   :  { %2172 = vmatprep.subr.mxu0 %v2011_v51 }
 0x6e4   :  { %2173 = vmatpush3.msra.mxu0 %v2011_v51 }
 0x6e5   :  { %2174 = vmatprep.subr.mxu0 %v2010_v53 }
 0x6e6   :  { %2175 = vmatpush3.msra.mxu0 %v2010_v53 }
 0x6e7   :  { %2176 = vmatprep.subr.mxu0 %v2009_v56 }
 0x6e8   :  { %2177 = vmatpush3.msra.mxu0 %v2009_v56 }
 0x789   :  { %v1896_v2 = vpop.f32.mrf.mxu0  ;;  %v1967_v3 = vpop.f32.mrf.mxu1 }
 0x78a   :  { %v1976_v5 = vrot.slane %v1896_v2, 2  ;;  %v1978_v15 = vrot.slane %v1967_v3, 2 }
 0x78b   :  { %v1898_v7 = vpop.f32.mrf.mxu0  ;;  %v1969_v8 = vpop.f32.mrf.mxu1 }
 0x78c   :  { %v1984_v9 = vadd.f32 %v1976_v5, %v1759_v60  ;;  %v1977_v10 = vrot.slane %v1898_v7, 2  ;;  %v1979_v11 = vrot.slane %v1969_v8, 2  ;;  %v1986_v17 = vadd.f32 %v1978_v15, %v1761_v16 }
 0x78e   :  { %2260 = vtanh.f32 %v1984_v9  ;;  %v1985_v13 = vadd.f32 %v1977_v10, %v1760_v6  ;;  %v1987_v14 = vadd.f32 %v1979_v11, %v1762_v12 }
 0x790   :  { %2262 = vtanh.f32 %v1985_v13 }
 0x791   :  { %2264 = vtanh.f32 %v1987_v14 }
 0x792   :  { %2266 = vtanh.f32 %v1986_v17 }
 0x79b   :  { %v2261_v18 = vpop.eup %2260 }
 0x79c   :  { %v1992_v19 = vmul.f32 0.5, %v2261_v18 }
 0x79d   :  { %v2263_v20 = vpop.eup %2262 }
 0x79e   :  { %v1995_v21 = vadd.f32 0.5, %v1992_v19  ;;  %v1993_v23 = vmul.f32 0.5, %v2263_v20  ;;  %v2265_v26 = vpop.eup %2264 }
 0x79f   :  { %v2267_v30 = vpop.eup %2266 }
 0x7a0   :  { %v1996_v24 = vadd.f32 0.5, %v1993_v23  ;;  %v2002_v28 = vmul.f32 %v2265_v26, %v1995_v21  ;;  %v1994_v31 = vmul.f32 0.5, %v2267_v30 }
 0x7a2   :  { %v2001_v27 = vmul.f32 %v1999_v25, %v1996_v24  ;;  %v1997_v32 = vadd.f32 0.5, %v1994_v31 }
 0x7a4   :  { %v2003_v29 = vadd.f32 %v2002_v28, %v2001_v27 }
 0x7a6   :  { %2268 = vtanh.f32 %v2003_v29 }
 0x7b3   :  { %v2269_v33 = vpop.eup %2268 }
 0x7b4   :  { %v2005_v34 = vmul.f32 %v2269_v33, %v1997_v32 }
 0x7b6   :  { %2006 = vst [vmem:[#allocation2 + $0x8] sm:$0xc0] %v2005_v34 }
 0x7bd   :  { %v2008_v35 = vld [vmem:[#allocation2 + $0x8] sm:$0xff] }
 0x7be   :  { %2179 = vmatmul.mubr.f32.vlgmr.msra.gmra.mxu0 %v2008_v35 }
 0x87e   :  { %v2180_v37 = vpop.f32.mrf.mxu0 }
 0x87f   :  { %v2104_v4 = vadd.f32 %v2180_v37, %v2127_v36 }
 0x880   :  { %v2098_v62 = vpop.f32.mrf.mxu0 }
 0x881   :  { %2108 = vst [vmem:[#allocation9 + $0x8] sm:$0xff] %v2104_v4  ;;  %v2099_v38 = vadd.f32 %v2127_v36, %v2098_v62 }
 0x883   :  { %2107 = vst [vmem:[#allocation9] sm:$0xff] %v2099_v38 }
 0x884   :  { %2341 = shalt.err (!%p2338_p5)
}
 0x885   :  { %2120 = dma.vmem_to_hbm [thread:$0]  %s2115_s8, 256, %s3229_s4, [#allocation5], %s2361_s1, %s2361_s1, %s2362_s30  }
 0x886   :  { %2354 = dma.done.wait [#allocation5], 256  }
 0x887   :  { %2355 = vsyncadd [#allocation5], 4294967040 }
 0x888   :  { %2124 = vsyncpa [#allocation4], 1 }
 0x889   :  { %2125 = vsyncpa [#allocation7], 1 }
 0x88a   :  { %2126 = vsyncpa [#allocation5], 1 }

</bundles_post_ra>
